<compile_context>
chip_gen: v7x
topology: tpu7x:2x2x1
jax: 0.10.0
libtpu: 0.0.40
codegen_flags: <defaults>
</compile_context>

<pallas_src>
import functools

import jax
import jax.numpy as jnp
from jax import lax
from jax.experimental import pallas as pl
from jax.experimental.pallas import tpu as pltpu


def _mhsa_kernel(x_ref, w_ref, b_ref, o_ref, *, n_heads, seq_valid):
    # x_ref : (Bt, S_pad, D)  -- Bt batch rows (MXU compute dtype)
    # w_ref : (D, 3D)         -- fused [Wq.T * inv_sqrt_scale | Wk.T | Wv.T]
    # b_ref : (1, 3D)         -- fused [bq * inv_sqrt_scale | bk | bv], f32
    # o_ref : (Bt, S_pad, D)  -- final-layout output block
    Bt, S_pad, D = x_ref.shape
    H = n_heads
    dh = D // H
    cdt = x_ref.dtype                               # MXU compute dtype

    # One fused QKV projection for all Bt rows: (Bt*S_pad, D) @ (D, 3D).
    x2d = x_ref[...].reshape(Bt * S_pad, D)
    qkv = jnp.dot(x2d, w_ref[...], preferred_element_type=jnp.float32)
    qkv = qkv + b_ref[...]                          # (Bt*S_pad, 3D) f32
    qkv_c = qkv.astype(cdt)                         # single hoisted cast

    need_mask = seq_valid < S_pad                   # static Python bool
    if need_mask:
        col = lax.broadcasted_iota(jnp.int32, (1, S_pad), 1)
        key_bias = jnp.where(col < seq_valid, 0.0, -1e30).astype(jnp.float32)

    for b in range(Bt):                             # static loops (Bt, H small)
        r0 = b * S_pad
        for h in range(H):
            q = qkv_c[r0:r0 + S_pad, h * dh:(h + 1) * dh]
            k = qkv_c[r0:r0 + S_pad, D + h * dh:D + (h + 1) * dh]
            v = qkv_c[r0:r0 + S_pad, 2 * D + h * dh:2 * D + (h + 1) * dh]

            # scores = q @ k^T, contracting dh axes directly (no k.T copy).
            scores = lax.dot_general(
                q, k, (((1,), (1,)), ((), ())),
                preferred_element_type=jnp.float32)  # (S_pad, S_pad) f32
            if need_mask:
                scores = scores + key_bias           # mask stays in f32

            # numerically-stable softmax in f32; reciprocal on the EUP slot.
            scores = scores - jnp.max(scores, axis=-1, keepdims=True)
            p = jnp.exp(scores)
            p = p * pl.reciprocal(jnp.sum(p, axis=-1, keepdims=True),
                                  approx=True)

            ctx = jnp.dot(p.astype(cdt), v,
                          preferred_element_type=jnp.float32)  # (S_pad, dh)
            # Direct store into the output block slice; the HBM writeback of
            # the full (Bt, S_pad, D) block remains a single lane-dense store.
            o_ref[b, :, h * dh:(h + 1) * dh] = ctx.astype(o_ref.dtype)


def _round_up(n, m):
    return ((n + m - 1) // m) * m


def _vmem_step_bytes(Bt, S_pad, D, cdt_bytes, out_bytes, single_buf_w):
    """Rough per-grid-step VMEM working set (bytes)."""
    x_blk = Bt * S_pad * D * cdt_bytes
    o_blk = Bt * S_pad * D * out_bytes
    w_blk = D * 3 * D * cdt_bytes + 3 * D * 4
    qkv = Bt * S_pad * 3 * D * (4 + cdt_bytes)       # f32 qkv + cast copy
    sc = 3 * S_pad * S_pad * 4                       # scores / exp temporaries
    return (2 * x_blk + 2 * o_blk
            + (1 if single_buf_w else 2) * w_blk + qkv + sc)


def _pick_rows_per_step(B, S_pad, D, cdt_bytes, out_bytes, budget_bytes):
    """Largest divisor of B that keeps >=2 grid steps (v7x megacore) and fits
    the per-step VMEM budget."""
    best = 1
    for r in range(1, B + 1):
        if B % r:
            continue
        if B > 1 and B // r < 2:
            continue                                  # keep 2 parallel steps
        if _vmem_step_bytes(r, S_pad, D, cdt_bytes, out_bytes, True) > budget_bytes:
            continue
        best = max(best, r)
    return best


def multi_headed_self_attention(x, wq, bq, wk, bk, wv, bv, *, n_heads,
                                att_scale='per_head',
                                mxu_dtype=jnp.bfloat16,
                                rows_per_step=None):
    """Pallas implementation of the PyTorch MultiHeadedSelfAttention.forward.

    x        : (B, S, D)
    wq/wk/wv : (D, D) in PyTorch nn.Linear layout (out_features, in_features)
    bq/bk/bv : (D,)
    mxu_dtype: MXU operand dtype when x is f32 (None keeps the input dtype).
    """
    B, S, D = x.shape
    H = n_heads
    assert D % H == 0
    scale = D if att_scale != 'per_head' else D // H
    inv_sqrt_scale = float(1.0 / (scale ** 0.5))

    out_dtype = x.dtype
    cdt = out_dtype
    if mxu_dtype is not None and x.dtype == jnp.float32:
        cdt = mxu_dtype     # bf16 operands + f32 accumulation

    # Glue: nn.Linear computes x @ W.T + b. Fuse Q/K/V into one (D, 3D) weight
    # and fold the attention scale into the Q columns (exact rewrite). Bias is
    # kept in f32 (added after the f32-accumulated matmul).
    w_qkv = jnp.concatenate(
        [wq.T * inv_sqrt_scale, wk.T, wv.T], axis=1).astype(cdt)       # (D, 3D)
    b_qkv = jnp.concatenate(
        [bq * inv_sqrt_scale, bk, bv]).reshape(1, 3 * D).astype(jnp.float32)

    # Sequence padding: lane multiple (128) when the S^2 softmax passes matter,
    # sublane multiple (8) for tiny sequences.
    if S % 128 == 0:
        S_pad = S
    elif S > 64:
        S_pad = _round_up(S, 128)
    else:
        S_pad = _round_up(S, 8)

    x_in = x.astype(cdt)
    if S_pad != S:
        x_in = jnp.pad(x_in, ((0, 0), (0, S_pad - S), (0, 0)))

    cdt_bytes = jnp.dtype(cdt).itemsize
    out_bytes = jnp.dtype(out_dtype).itemsize
    if rows_per_step is None:
        rows_per_step = _pick_rows_per_step(
            B, S_pad, D, cdt_bytes, out_bytes, budget_bytes=24 * 1024 * 1024)
    if B % rows_per_step:
        rows_per_step = 1
    n_steps = B // rows_per_step

    est = _vmem_step_bytes(rows_per_step, S_pad, D, cdt_bytes, out_bytes, True)
    vmem_limit = None
    if est > 32 * 1024 * 1024:
        # Raise the scoped limit instead of shrinking blocks (v6e has 128 MiB
        # physical); cap well below that for portability.
        vmem_limit = min(int(est * 1.25), 96 * 1024 * 1024)

    kernel = functools.partial(_mhsa_kernel, n_heads=H, seq_valid=S)

    def run(single_buffer_weights):
        wb_kwargs = ({'pipeline_mode': pl.Buffered(1)}
                     if single_buffer_weights else {})
        return pl.pallas_call(
            kernel,
            out_shape=jax.ShapeDtypeStruct((B, S_pad, D), out_dtype),
            grid=(n_steps,),
            in_specs=[
                pl.BlockSpec((rows_per_step, S_pad, D), lambda i: (i, 0, 0)),
                pl.BlockSpec((D, 3 * D), lambda i: (0, 0), **wb_kwargs),
                pl.BlockSpec((1, 3 * D), lambda i: (0, 0), **wb_kwargs),
            ],
            out_specs=pl.BlockSpec((rows_per_step, S_pad, D),
                                   lambda i: (i, 0, 0)),
            compiler_params=pltpu.CompilerParams(
                dimension_semantics=("parallel",),
                vmem_limit_bytes=vmem_limit),
        )(x_in, w_qkv, b_qkv)

    try:
        # Weights/bias are grid-invariant: single-buffer them (saves ~7 MiB of
        # VMEM at ViT-Base sizes).
        out = run(True)
    except Exception:
        # Fallback for JAX/TPU builds without pipeline_mode support.
        out = run(False)

    # Kernel already wrote the final (B, S_pad, D) layout; drop padding only.
    return out[:, :S, :] if S_pad != S else out


def _reference(x, wq, bq, wk, bk, wv, bv, n_heads, att_scale='per_head'):
    """Pure-JAX replica of the PyTorch forward, for verification."""
    B, S, D = x.shape
    H = n_heads
    dh = D // H
    scale = D if att_scale != 'per_head' else D // H

    def lin(w, b):
        return x @ w.T + b

    def split(t):
        return t.reshape(B, S, H, dh).transpose(0, 2, 1, 3)

    q, k, v = split(lin(wq, bq)), split(lin(wk, bk)), split(lin(wv, bv))
    scores = (q @ k.transpose(0, 1, 3, 2)) / (scale ** 0.5)
    scores = jax.nn.softmax(scores, axis=-1)
    h = (scores @ v).transpose(0, 2, 1, 3)
    return h.reshape(B, S, D)


if __name__ == "__main__":
    key = jax.random.PRNGKey(0)
    kx, kwq, kbq, kwk, kbk, kwv, kbv, kx2, kx3 = jax.random.split(key, 9)

    B, S, D, H = 2, 8, 32, 4   # dim=32, heads=4, seq=8, batch=2
    x = jax.random.normal(kx, (B, S, D), dtype=jnp.float32)
    # deterministic synthetic Linear params (PyTorch layout: (out, in))
    wq = jax.random.normal(kwq, (D, D), dtype=jnp.float32) * 0.05
    wk = jax.random.normal(kwk, (D, D), dtype=jnp.float32) * 0.05
    wv = jax.random.normal(kwv, (D, D), dtype=jnp.float32) * 0.05
    bq = jax.random.normal(kbq, (D,), dtype=jnp.float32) * 0.05
    bk = jax.random.normal(kbk, (D,), dtype=jnp.float32) * 0.05
    bv = jax.random.normal(kbv, (D,), dtype=jnp.float32) * 0.05

    # Case 1: per-head scale, default bf16 MXU operands (f32 accumulation).
    out = multi_headed_self_attention(
        x, wq, bq, wk, bk, wv, bv, n_heads=H, att_scale='per_head')
    out = jax.block_until_ready(out)
    ref = _reference(x, wq, bq, wk, bk, wv, bv, H, 'per_head')
    assert out.shape == (B, S, D)
    assert jnp.allclose(out, ref, atol=1e-2, rtol=1e-2), \
        f"case1 max err {jnp.max(jnp.abs(out - ref))}"

    # Case 2: non-multiple-of-8 sequence (pad + key-mask path) + 'full' scale.
    S2 = 12
    x2 = jax.random.normal(kx2, (1, S2, D), dtype=jnp.float32)
    out2 = multi_headed_self_attention(
        x2, wq, bq, wk, bk, wv, bv, n_heads=H, att_scale='full')
    out2 = jax.block_until_ready(out2)
    ref2 = _reference(x2, wq, bq, wk, bk, wv, bv, H, 'full')
    assert out2.shape == (1, S2, D)
    assert jnp.allclose(out2, ref2, atol=1e-2, rtol=1e-2), \
        f"case2 max err {jnp.max(jnp.abs(out2 - ref2))}"

    # Case 3: B=4 exercises rows_per_step=2 (two batch rows per grid step) and
    # the full-precision (input dtype) MXU path for tight parity.
    x3 = jax.random.normal(kx3, (4, S, D), dtype=jnp.float32)
    out3 = multi_headed_self_attention(
        x3, wq, bq, wk, bk, wv, bv, n_heads=H, att_scale='per_head',
        mxu_dtype=None)
    out3 = jax.block_until_ready(out3)
    ref3 = _reference(x3, wq, bq, wk, bk, wv, bv, H, 'per_head')
    assert out3.shape == (4, S, D)
    assert jnp.allclose(out3, ref3, atol=2e-3, rtol=2e-3), \
        f"case3 max err {jnp.max(jnp.abs(out3 - ref3))}"

    print("KERNEL_OK")
</pallas_src>

<mosaic_0001>
module attributes {stable_mosaic.version = 11 : i64} {
  func.func @_mhsa_kernel(%arg0: i32, %arg1: memref<1x8x32xbf16, #tpu.memory_space<vmem>>, %arg2: memref<32x96xbf16, #tpu.memory_space<vmem>>, %arg3: memref<1x96xf32, #tpu.memory_space<vmem>>, %arg4: memref<1x8x32xf32, #tpu.memory_space<vmem>>) attributes {dimension_semantics = [#tpu.dimension_semantics<parallel>], iteration_bounds = array<i64: 2>, scalar_prefetch = 0 : i64, scratch_operands = 0 : i64, tpu.core_type = #tpu.core_type<tc>, window_params = [{transform_indices = @transform_0, window_bounds = array<i64: 1, 8, 32>}, {pipeline_mode = #tpu.pipeline_mode<synchronous>, transform_indices = @transform_1, window_bounds = array<i64: 32, 96>}, {pipeline_mode = #tpu.pipeline_mode<synchronous>, transform_indices = @transform_2, window_bounds = array<i64: 1, 96>}, {transform_indices = @transform_3, window_bounds = array<i64: 1, 8, 32>}]} {
    %c0 = arith.constant 0 : index
    %c0_0 = arith.constant 0 : index
    %c0_1 = arith.constant 0 : index
    %0 = vector.load %arg1[%c0, %c0_0, %c0_1] : memref<1x8x32xbf16, #tpu.memory_space<vmem>>, vector<1x8x32xbf16>
    %1 = vector.shape_cast %0 : vector<1x8x32xbf16> to vector<8x32xbf16>
    %c0_2 = arith.constant 0 : index
    %c0_3 = arith.constant 0 : index
    %2 = vector.load %arg2[%c0_2, %c0_3] : memref<32x96xbf16, #tpu.memory_space<vmem>>, vector<32x96xbf16>
    %cst = arith.constant dense<0.000000e+00> : vector<8x96xf32>
    %3 = tpu.matmul %1, %2, %cst {dimension_numbers = #tpu.dot_dimension_numbers<[1], [0], [0], [1], [0, 0, 1, 1], [], []>} : vector<8x32xbf16>, vector<32x96xbf16>, vector<8x96xf32> -> vector<8x96xf32>
    %c0_4 = arith.constant 0 : index
    %c0_5 = arith.constant 0 : index
    %4 = vector.load %arg3[%c0_4, %c0_5] : memref<1x96xf32, #tpu.memory_space<vmem>>, vector<1x96xf32>
    %5 = vector.broadcast %4 : vector<1x96xf32> to vector<8x96xf32>
    %6 = arith.addf %3, %5 : vector<8x96xf32>
    %7 = arith.truncf %6 : vector<8x96xf32> to vector<8x96xbf16>
    %8 = vector.extract_strided_slice %7 {offsets = [0, 0], sizes = [8, 8], strides = [1, 1]} : vector<8x96xbf16> to vector<8x8xbf16>
    %9 = vector.extract_strided_slice %7 {offsets = [0, 32], sizes = [8, 8], strides = [1, 1]} : vector<8x96xbf16> to vector<8x8xbf16>
    %10 = vector.extract_strided_slice %7 {offsets = [0, 64], sizes = [8, 8], strides = [1, 1]} : vector<8x96xbf16> to vector<8x8xbf16>
    %cst_6 = arith.constant dense<0.000000e+00> : vector<8x8xf32>
    %11 = tpu.matmul %8, %9, %cst_6 {dimension_numbers = #tpu.dot_dimension_numbers<[1], [1], [0], [0], [0, 0, 1, 0], [], []>} : vector<8x8xbf16>, vector<8x8xbf16>, vector<8x8xf32> -> vector<8x8xf32>
    %cst_7 = arith.constant dense<0xFF800000> : vector<8xf32>
    %12 = vector.multi_reduction <maximumf>, %11, %cst_7 [1] : vector<8x8xf32> to vector<8xf32>
    %13 = vector.shape_cast %12 : vector<8xf32> to vector<8x1xf32>
    %14 = vector.broadcast %13 : vector<8x1xf32> to vector<8x8xf32>
    %15 = arith.subf %11, %14 : vector<8x8xf32>
    %16 = math.exp %15 : vector<8x8xf32>
    %cst_8 = arith.constant dense<0.000000e+00> : vector<8xf32>
    %17 = vector.multi_reduction <add>, %16, %cst_8 [1] : vector<8x8xf32> to vector<8xf32>
    %18 = vector.shape_cast %17 : vector<8xf32> to vector<8x1xf32>
    %19 = tpu.reciprocal %18 {approx = true} : vector<8x1xf32> -> vector<8x1xf32>
    %20 = vector.broadcast %19 : vector<8x1xf32> to vector<8x8xf32>
    %21 = arith.mulf %16, %20 : vector<8x8xf32>
    %22 = arith.truncf %21 : vector<8x8xf32> to vector<8x8xbf16>
    %cst_9 = arith.constant dense<0.000000e+00> : vector<8x8xf32>
    %23 = tpu.matmul %22, %10, %cst_9 {dimension_numbers = #tpu.dot_dimension_numbers<[1], [0], [0], [1], [0, 0, 1, 1], [], []>} : vector<8x8xbf16>, vector<8x8xbf16>, vector<8x8xf32> -> vector<8x8xf32>
    %c0_10 = arith.constant 0 : index
    %c0_11 = arith.constant 0 : index
    %c0_12 = arith.constant 0 : index
    %24 = vector.load %arg4[%c0_10, %c0_11, %c0_12] : memref<1x8x32xf32, #tpu.memory_space<vmem>>, vector<1x8x8xf32>
    %25 = vector.shape_cast %24 : vector<1x8x8xf32> to vector<8x8xf32>
    %26 = vector.shape_cast %23 : vector<8x8xf32> to vector<1x8x8xf32>
    tpu.vector_store %arg4[%c0_10, %c0_11, %c0_12], %26 {strides = array<i32>} : memref<1x8x32xf32, #tpu.memory_space<vmem>>, vector<1x8x8xf32>,
    %27 = vector.extract_strided_slice %7 {offsets = [0, 8], sizes = [8, 8], strides = [1, 1]} : vector<8x96xbf16> to vector<8x8xbf16>
    %28 = vector.extract_strided_slice %7 {offsets = [0, 40], sizes = [8, 8], strides = [1, 1]} : vector<8x96xbf16> to vector<8x8xbf16>
    %29 = vector.extract_strided_slice %7 {offsets = [0, 72], sizes = [8, 8], strides = [1, 1]} : vector<8x96xbf16> to vector<8x8xbf16>
    %cst_13 = arith.constant dense<0.000000e+00> : vector<8x8xf32>
    %30 = tpu.matmul %27, %28, %cst_13 {dimension_numbers = #tpu.dot_dimension_numbers<[1], [1], [0], [0], [0, 0, 1, 0], [], []>} : vector<8x8xbf16>, vector<8x8xbf16>, vector<8x8xf32> -> vector<8x8xf32>
    %cst_14 = arith.constant dense<0xFF800000> : vector<8xf32>
    %31 = vector.multi_reduction <maximumf>, %30, %cst_14 [1] : vector<8x8xf32> to vector<8xf32>
    %32 = vector.shape_cast %31 : vector<8xf32> to vector<8x1xf32>
    %33 = vector.broadcast %32 : vector<8x1xf32> to vector<8x8xf32>
    %34 = arith.subf %30, %33 : vector<8x8xf32>
    %35 = math.exp %34 : vector<8x8xf32>
    %cst_15 = arith.constant dense<0.000000e+00> : vector<8xf32>
    %36 = vector.multi_reduction <add>, %35, %cst_15 [1] : vector<8x8xf32> to vector<8xf32>
    %37 = vector.shape_cast %36 : vector<8xf32> to vector<8x1xf32>
    %38 = tpu.reciprocal %37 {approx = true} : vector<8x1xf32> -> vector<8x1xf32>
    %39 = vector.broadcast %38 : vector<8x1xf32> to vector<8x8xf32>
    %40 = arith.mulf %35, %39 : vector<8x8xf32>
    %41 = arith.truncf %40 : vector<8x8xf32> to vector<8x8xbf16>
    %cst_16 = arith.constant dense<0.000000e+00> : vector<8x8xf32>
    %42 = tpu.matmul %41, %29, %cst_16 {dimension_numbers = #tpu.dot_dimension_numbers<[1], [0], [0], [1], [0, 0, 1, 1], [], []>} : vector<8x8xbf16>, vector<8x8xbf16>, vector<8x8xf32> -> vector<8x8xf32>
    %c0_17 = arith.constant 0 : index
    %c0_18 = arith.constant 0 : index
    %c8 = arith.constant 8 : index
    %43 = vector.load %arg4[%c0_17, %c0_18, %c8] : memref<1x8x32xf32, #tpu.memory_space<vmem>>, vector<1x8x8xf32>
    %44 = vector.shape_cast %43 : vector<1x8x8xf32> to vector<8x8xf32>
    %45 = vector.shape_cast %42 : vector<8x8xf32> to vector<1x8x8xf32>
    tpu.vector_store %arg4[%c0_17, %c0_18, %c8], %45 {strides = array<i32>} : memref<1x8x32xf32, #tpu.memory_space<vmem>>, vector<1x8x8xf32>,
    %46 = vector.extract_strided_slice %7 {offsets = [0, 16], sizes = [8, 8], strides = [1, 1]} : vector<8x96xbf16> to vector<8x8xbf16>
    %47 = vector.extract_strided_slice %7 {offsets = [0, 48], sizes = [8, 8], strides = [1, 1]} : vector<8x96xbf16> to vector<8x8xbf16>
    %48 = vector.extract_strided_slice %7 {offsets = [0, 80], sizes = [8, 8], strides = [1, 1]} : vector<8x96xbf16> to vector<8x8xbf16>
    %cst_19 = arith.constant dense<0.000000e+00> : vector<8x8xf32>
    %49 = tpu.matmul %46, %47, %cst_19 {dimension_numbers = #tpu.dot_dimension_numbers<[1], [1], [0], [0], [0, 0, 1, 0], [], []>} : vector<8x8xbf16>, vector<8x8xbf16>, vector<8x8xf32> -> vector<8x8xf32>
    %cst_20 = arith.constant dense<0xFF800000> : vector<8xf32>
    %50 = vector.multi_reduction <maximumf>, %49, %cst_20 [1] : vector<8x8xf32> to vector<8xf32>
    %51 = vector.shape_cast %50 : vector<8xf32> to vector<8x1xf32>
    %52 = vector.broadcast %51 : vector<8x1xf32> to vector<8x8xf32>
    %53 = arith.subf %49, %52 : vector<8x8xf32>
    %54 = math.exp %53 : vector<8x8xf32>
    %cst_21 = arith.constant dense<0.000000e+00> : vector<8xf32>
    %55 = vector.multi_reduction <add>, %54, %cst_21 [1] : vector<8x8xf32> to vector<8xf32>
    %56 = vector.shape_cast %55 : vector<8xf32> to vector<8x1xf32>
    %57 = tpu.reciprocal %56 {approx = true} : vector<8x1xf32> -> vector<8x1xf32>
    %58 = vector.broadcast %57 : vector<8x1xf32> to vector<8x8xf32>
    %59 = arith.mulf %54, %58 : vector<8x8xf32>
    %60 = arith.truncf %59 : vector<8x8xf32> to vector<8x8xbf16>
    %cst_22 = arith.constant dense<0.000000e+00> : vector<8x8xf32>
    %61 = tpu.matmul %60, %48, %cst_22 {dimension_numbers = #tpu.dot_dimension_numbers<[1], [0], [0], [1], [0, 0, 1, 1], [], []>} : vector<8x8xbf16>, vector<8x8xbf16>, vector<8x8xf32> -> vector<8x8xf32>
    %c0_23 = arith.constant 0 : index
    %c0_24 = arith.constant 0 : index
    %c16 = arith.constant 16 : index
    %62 = vector.load %arg4[%c0_23, %c0_24, %c16] : memref<1x8x32xf32, #tpu.memory_space<vmem>>, vector<1x8x8xf32>
    %63 = vector.shape_cast %62 : vector<1x8x8xf32> to vector<8x8xf32>
    %64 = vector.shape_cast %61 : vector<8x8xf32> to vector<1x8x8xf32>
    tpu.vector_store %arg4[%c0_23, %c0_24, %c16], %64 {strides = array<i32>} : memref<1x8x32xf32, #tpu.memory_space<vmem>>, vector<1x8x8xf32>,
    %65 = vector.extract_strided_slice %7 {offsets = [0, 24], sizes = [8, 8], strides = [1, 1]} : vector<8x96xbf16> to vector<8x8xbf16>
    %66 = vector.extract_strided_slice %7 {offsets = [0, 56], sizes = [8, 8], strides = [1, 1]} : vector<8x96xbf16> to vector<8x8xbf16>
    %67 = vector.extract_strided_slice %7 {offsets = [0, 88], sizes = [8, 8], strides = [1, 1]} : vector<8x96xbf16> to vector<8x8xbf16>
    %cst_25 = arith.constant dense<0.000000e+00> : vector<8x8xf32>
    %68 = tpu.matmul %65, %66, %cst_25 {dimension_numbers = #tpu.dot_dimension_numbers<[1], [1], [0], [0], [0, 0, 1, 0], [], []>} : vector<8x8xbf16>, vector<8x8xbf16>, vector<8x8xf32> -> vector<8x8xf32>
    %cst_26 = arith.constant dense<0xFF800000> : vector<8xf32>
    %69 = vector.multi_reduction <maximumf>, %68, %cst_26 [1] : vector<8x8xf32> to vector<8xf32>
    %70 = vector.shape_cast %69 : vector<8xf32> to vector<8x1xf32>
    %71 = vector.broadcast %70 : vector<8x1xf32> to vector<8x8xf32>
    %72 = arith.subf %68, %71 : vector<8x8xf32>
    %73 = math.exp %72 : vector<8x8xf32>
    %cst_27 = arith.constant dense<0.000000e+00> : vector<8xf32>
    %74 = vector.multi_reduction <add>, %73, %cst_27 [1] : vector<8x8xf32> to vector<8xf32>
    %75 = vector.shape_cast %74 : vector<8xf32> to vector<8x1xf32>
    %76 = tpu.reciprocal %75 {approx = true} : vector<8x1xf32> -> vector<8x1xf32>
    %77 = vector.broadcast %76 : vector<8x1xf32> to vector<8x8xf32>
    %78 = arith.mulf %73, %77 : vector<8x8xf32>
    %79 = arith.truncf %78 : vector<8x8xf32> to vector<8x8xbf16>
    %cst_28 = arith.constant dense<0.000000e+00> : vector<8x8xf32>
    %80 = tpu.matmul %79, %67, %cst_28 {dimension_numbers = #tpu.dot_dimension_numbers<[1], [0], [0], [1], [0, 0, 1, 1], [], []>} : vector<8x8xbf16>, vector<8x8xbf16>, vector<8x8xf32> -> vector<8x8xf32>
    %c0_29 = arith.constant 0 : index
    %c0_30 = arith.constant 0 : index
    %c24 = arith.constant 24 : index
    %81 = vector.load %arg4[%c0_29, %c0_30, %c24] : memref<1x8x32xf32, #tpu.memory_space<vmem>>, vector<1x8x8xf32>
    %82 = vector.shape_cast %81 : vector<1x8x8xf32> to vector<8x8xf32>
    %83 = vector.shape_cast %80 : vector<8x8xf32> to vector<1x8x8xf32>
    tpu.vector_store %arg4[%c0_29, %c0_30, %c24], %83 {strides = array<i32>} : memref<1x8x32xf32, #tpu.memory_space<vmem>>, vector<1x8x8xf32>,
    return
  }
  func.func @transform_0(%arg0: i32) -> (i32, i32, i32) {
    %c0_i32 = arith.constant 0 : i32
    %c0_i32_0 = arith.constant 0 : i32
    %c0_i32_1 = arith.constant 0 : i32
    return %arg0, %c0_i32, %c0_i32_0 : i32, i32, i32
  }
  func.func @transform_1(%arg0: i32) -> (i32, i32) {
    %c0_i32 = arith.constant 0 : i32
    %c0_i32_0 = arith.constant 0 : i32
    %c0_i32_1 = arith.constant 0 : i32
    return %c0_i32, %c0_i32_0 : i32, i32
  }
  func.func @transform_2(%arg0: i32) -> (i32, i32) {
    %c0_i32 = arith.constant 0 : i32
    %c0_i32_0 = arith.constant 0 : i32
    %c0_i32_1 = arith.constant 0 : i32
    return %c0_i32, %c0_i32_0 : i32, i32
  }
  func.func @transform_3(%arg0: i32) -> (i32, i32, i32) {
    %c0_i32 = arith.constant 0 : i32
    %c0_i32_0 = arith.constant 0 : i32
    %c0_i32_1 = arith.constant 0 : i32
    return %arg0, %c0_i32, %c0_i32_0 : i32, i32, i32
  }
}

module attributes {stable_mosaic.version = 11 : i64} {
  func.func @_mhsa_kernel(%arg0: i32, %arg1: memref<1x8x32xbf16, #tpu.memory_space<vmem>>, %arg2: memref<32x96xbf16, #tpu.memory_space<vmem>>, %arg3: memref<1x96xf32, #tpu.memory_space<vmem>>, %arg4: memref<1x8x32xf32, #tpu.memory_space<vmem>>) attributes {dimension_semantics = [#tpu.dimension_semantics<parallel>], iteration_bounds = array<i64: 2>, scalar_prefetch = 0 : i64, scratch_operands = 0 : i64, tpu.core_type = #tpu.core_type<tc>, window_params = [{transform_indices = @transform_0, window_bounds = array<i64: 1, 8, 32>}, {pipeline_mode = #tpu.pipeline_mode<synchronous>, transform_indices = @transform_1, window_bounds = array<i64: 32, 96>}, {pipeline_mode = #tpu.pipeline_mode<synchronous>, transform_indices = @transform_2, window_bounds = array<i64: 1, 96>}, {transform_indices = @transform_3, window_bounds = array<i64: 1, 8, 32>}]} {
    %c0 = arith.constant 0 : index
    %c0_0 = arith.constant 0 : index
    %c0_1 = arith.constant 0 : index
    %0 = vector.load %arg1[%c0, %c0_0, %c0_1] : memref<1x8x32xbf16, #tpu.memory_space<vmem>>, vector<1x8x32xbf16>
    %1 = vector.shape_cast %0 : vector<1x8x32xbf16> to vector<8x32xbf16>
    %c0_2 = arith.constant 0 : index
    %c0_3 = arith.constant 0 : index
    %2 = vector.load %arg2[%c0_2, %c0_3] : memref<32x96xbf16, #tpu.memory_space<vmem>>, vector<32x96xbf16>
    %cst = arith.constant dense<0.000000e+00> : vector<8x96xf32>
    %3 = tpu.matmul %1, %2, %cst {dimension_numbers = #tpu.dot_dimension_numbers<[1], [0], [0], [1], [0, 0, 1, 1], [], []>} : vector<8x32xbf16>, vector<32x96xbf16>, vector<8x96xf32> -> vector<8x96xf32>
    %c0_4 = arith.constant 0 : index
    %c0_5 = arith.constant 0 : index
    %4 = vector.load %arg3[%c0_4, %c0_5] : memref<1x96xf32, #tpu.memory_space<vmem>>, vector<1x96xf32>
    %5 = vector.broadcast %4 : vector<1x96xf32> to vector<8x96xf32>
    %6 = arith.addf %3, %5 : vector<8x96xf32>
    %7 = arith.truncf %6 : vector<8x96xf32> to vector<8x96xbf16>
    %8 = vector.extract_strided_slice %7 {offsets = [0, 0], sizes = [8, 8], strides = [1, 1]} : vector<8x96xbf16> to vector<8x8xbf16>
    %9 = vector.extract_strided_slice %7 {offsets = [0, 32], sizes = [8, 8], strides = [1, 1]} : vector<8x96xbf16> to vector<8x8xbf16>
    %10 = vector.extract_strided_slice %7 {offsets = [0, 64], sizes = [8, 8], strides = [1, 1]} : vector<8x96xbf16> to vector<8x8xbf16>
    %cst_6 = arith.constant dense<0.000000e+00> : vector<8x8xf32>
    %11 = tpu.matmul %8, %9, %cst_6 {dimension_numbers = #tpu.dot_dimension_numbers<[1], [1], [0], [0], [0, 0, 1, 0], [], []>} : vector<8x8xbf16>, vector<8x8xbf16>, vector<8x8xf32> -> vector<8x8xf32>
    %cst_7 = arith.constant dense<0xFF800000> : vector<8xf32>
    %12 = vector.multi_reduction <maximumf>, %11, %cst_7 [1] : vector<8x8xf32> to vector<8xf32>
    %13 = vector.shape_cast %12 : vector<8xf32> to vector<8x1xf32>
    %14 = vector.broadcast %13 : vector<8x1xf32> to vector<8x8xf32>
    %15 = arith.subf %11, %14 : vector<8x8xf32>
    %16 = math.exp %15 : vector<8x8xf32>
    %cst_8 = arith.constant dense<0.000000e+00> : vector<8xf32>
    %17 = vector.multi_reduction <add>, %16, %cst_8 [1] : vector<8x8xf32> to vector<8xf32>
    %18 = vector.shape_cast %17 : vector<8xf32> to vector<8x1xf32>
    %19 = tpu.reciprocal %18 {approx = true} : vector<8x1xf32> -> vector<8x1xf32>
    %20 = vector.broadcast %19 : vector<8x1xf32> to vector<8x8xf32>
    %21 = arith.mulf %16, %20 : vector<8x8xf32>
    %22 = arith.truncf %21 : vector<8x8xf32> to vector<8x8xbf16>
    %cst_9 = arith.constant dense<0.000000e+00> : vector<8x8xf32>
    %23 = tpu.matmul %22, %10, %cst_9 {dimension_numbers = #tpu.dot_dimension_numbers<[1], [0], [0], [1], [0, 0, 1, 1], [], []>} : vector<8x8xbf16>, vector<8x8xbf16>, vector<8x8xf32> -> vector<8x8xf32>
    %c0_10 = arith.constant 0 : index
    %c0_11 = arith.constant 0 : index
    %c0_12 = arith.constant 0 : index
    %24 = vector.load %arg4[%c0_10, %c0_11, %c0_12] : memref<1x8x32xf32, #tpu.memory_space<vmem>>, vector<1x8x8xf32>
    %25 = vector.shape_cast %24 : vector<1x8x8xf32> to vector<8x8xf32>
    %26 = vector.shape_cast %23 : vector<8x8xf32> to vector<1x8x8xf32>
    tpu.vector_store %arg4[%c0_10, %c0_11, %c0_12], %26 {strides = array<i32>} : memref<1x8x32xf32, #tpu.memory_space<vmem>>, vector<1x8x8xf32>,
    %27 = vector.extract_strided_slice %7 {offsets = [0, 8], sizes = [8, 8], strides = [1, 1]} : vector<8x96xbf16> to vector<8x8xbf16>
    %28 = vector.extract_strided_slice %7 {offsets = [0, 40], sizes = [8, 8], strides = [1, 1]} : vector<8x96xbf16> to vector<8x8xbf16>
    %29 = vector.extract_strided_slice %7 {offsets = [0, 72], sizes = [8, 8], strides = [1, 1]} : vector<8x96xbf16> to vector<8x8xbf16>
    %cst_13 = arith.constant dense<0.000000e+00> : vector<8x8xf32>
    %30 = tpu.matmul %27, %28, %cst_13 {dimension_numbers = #tpu.dot_dimension_numbers<[1], [1], [0], [0], [0, 0, 1, 0], [], []>} : vector<8x8xbf16>, vector<8x8xbf16>, vector<8x8xf32> -> vector<8x8xf32>
    %cst_14 = arith.constant dense<0xFF800000> : vector<8xf32>
    %31 = vector.multi_reduction <maximumf>, %30, %cst_14 [1] : vector<8x8xf32> to vector<8xf32>
    %32 = vector.shape_cast %31 : vector<8xf32> to vector<8x1xf32>
    %33 = vector.broadcast %32 : vector<8x1xf32> to vector<8x8xf32>
    %34 = arith.subf %30, %33 : vector<8x8xf32>
    %35 = math.exp %34 : vector<8x8xf32>
    %cst_15 = arith.constant dense<0.000000e+00> : vector<8xf32>
    %36 = vector.multi_reduction <add>, %35, %cst_15 [1] : vector<8x8xf32> to vector<8xf32>
    %37 = vector.shape_cast %36 : vector<8xf32> to vector<8x1xf32>
    %38 = tpu.reciprocal %37 {approx = true} : vector<8x1xf32> -> vector<8x1xf32>
    %39 = vector.broadcast %38 : vector<8x1xf32> to vector<8x8xf32>
    %40 = arith.mulf %35, %39 : vector<8x8xf32>
    %41 = arith.truncf %40 : vector<8x8xf32> to vector<8x8xbf16>
    %cst_16 = arith.constant dense<0.000000e+00> : vector<8x8xf32>
    %42 = tpu.matmul %41, %29, %cst_16 {dimension_numbers = #tpu.dot_dimension_numbers<[1], [0], [0], [1], [0, 0, 1, 1], [], []>} : vector<8x8xbf16>, vector<8x8xbf16>, vector<8x8xf32> -> vector<8x8xf32>
    %c0_17 = arith.constant 0 : index
    %c0_18 = arith.constant 0 : index
    %c8 = arith.constant 8 : index
    %43 = vector.load %arg4[%c0_17, %c0_18, %c8] : memref<1x8x32xf32, #tpu.memory_space<vmem>>, vector<1x8x8xf32>
    %44 = vector.shape_cast %43 : vector<1x8x8xf32> to vector<8x8xf32>
    %45 = vector.shape_cast %42 : vector<8x8xf32> to vector<1x8x8xf32>
    tpu.vector_store %arg4[%c0_17, %c0_18, %c8], %45 {strides = array<i32>} : memref<1x8x32xf32, #tpu.memory_space<vmem>>, vector<1x8x8xf32>,
    %46 = vector.extract_strided_slice %7 {offsets = [0, 16], sizes = [8, 8], strides = [1, 1]} : vector<8x96xbf16> to vector<8x8xbf16>
    %47 = vector.extract_strided_slice %7 {offsets = [0, 48], sizes = [8, 8], strides = [1, 1]} : vector<8x96xbf16> to vector<8x8xbf16>
    %48 = vector.extract_strided_slice %7 {offsets = [0, 80], sizes = [8, 8], strides = [1, 1]} : vector<8x96xbf16> to vector<8x8xbf16>
    %cst_19 = arith.constant dense<0.000000e+00> : vector<8x8xf32>
    %49 = tpu.matmul %46, %47, %cst_19 {dimension_numbers = #tpu.dot_dimension_numbers<[1], [1], [0], [0], [0, 0, 1, 0], [], []>} : vector<8x8xbf16>, vector<8x8xbf16>, vector<8x8xf32> -> vector<8x8xf32>
    %cst_20 = arith.constant dense<0xFF800000> : vector<8xf32>
    %50 = vector.multi_reduction <maximumf>, %49, %cst_20 [1] : vector<8x8xf32> to vector<8xf32>
    %51 = vector.shape_cast %50 : vector<8xf32> to vector<8x1xf32>
    %52 = vector.broadcast %51 : vector<8x1xf32> to vector<8x8xf32>
    %53 = arith.subf %49, %52 : vector<8x8xf32>
    %54 = math.exp %53 : vector<8x8xf32>
    %cst_21 = arith.constant dense<0.000000e+00> : vector<8xf32>
    %55 = vector.multi_reduction <add>, %54, %cst_21 [1] : vector<8x8xf32> to vector<8xf32>
    %56 = vector.shape_cast %55 : vector<8xf32> to vector<8x1xf32>
    %57 = tpu.reciprocal %56 {approx = true} : vector<8x1xf32> -> vector<8x1xf32>
    %58 = vector.broadcast %57 : vector<8x1xf32> to vector<8x8xf32>
    %59 = arith.mulf %54, %58 : vector<8x8xf32>
    %60 = arith.truncf %59 : vector<8x8xf32> to vector<8x8xbf16>
    %cst_22 = arith.constant dense<0.000000e+00> : vector<8x8xf32>
    %61 = tpu.matmul %60, %48, %cst_22 {dimension_numbers = #tpu.dot_dimension_numbers<[1], [0], [0], [1], [0, 0, 1, 1], [], []>} : vector<8x8xbf16>, vector<8x8xbf16>, vector<8x8xf32> -> vector<8x8xf32>
    %c0_23 = arith.constant 0 : index
    %c0_24 = arith.constant 0 : index
    %c16 = arith.constant 16 : index
    %62 = vector.load %arg4[%c0_23, %c0_24, %c16] : memref<1x8x32xf32, #tpu.memory_space<vmem>>, vector<1x8x8xf32>
    %63 = vector.shape_cast %62 : vector<1x8x8xf32> to vector<8x8xf32>
    %64 = vector.shape_cast %61 : vector<8x8xf32> to vector<1x8x8xf32>
    tpu.vector_store %arg4[%c0_23, %c0_24, %c16], %64 {strides = array<i32>} : memref<1x8x32xf32, #tpu.memory_space<vmem>>, vector<1x8x8xf32>,
    %65 = vector.extract_strided_slice %7 {offsets = [0, 24], sizes = [8, 8], strides = [1, 1]} : vector<8x96xbf16> to vector<8x8xbf16>
    %66 = vector.extract_strided_slice %7 {offsets = [0, 56], sizes = [8, 8], strides = [1, 1]} : vector<8x96xbf16> to vector<8x8xbf16>
    %67 = vector.extract_strided_slice %7 {offsets = [0, 88], sizes = [8, 8], strides = [1, 1]} : vector<8x96xbf16> to vector<8x8xbf16>
    %cst_25 = arith.constant dense<0.000000e+00> : vector<8x8xf32>
    %68 = tpu.matmul %65, %66, %cst_25 {dimension_numbers = #tpu.dot_dimension_numbers<[1], [1], [0], [0], [0, 0, 1, 0], [], []>} : vector<8x8xbf16>, vector<8x8xbf16>, vector<8x8xf32> -> vector<8x8xf32>
    %cst_26 = arith.constant dense<0xFF800000> : vector<8xf32>
    %69 = vector.multi_reduction <maximumf>, %68, %cst_26 [1] : vector<8x8xf32> to vector<8xf32>
    %70 = vector.shape_cast %69 : vector<8xf32> to vector<8x1xf32>
    %71 = vector.broadcast %70 : vector<8x1xf32> to vector<8x8xf32>
    %72 = arith.subf %68, %71 : vector<8x8xf32>
    %73 = math.exp %72 : vector<8x8xf32>
    %cst_27 = arith.constant dense<0.000000e+00> : vector<8xf32>
    %74 = vector.multi_reduction <add>, %73, %cst_27 [1] : vector<8x8xf32> to vector<8xf32>
    %75 = vector.shape_cast %74 : vector<8xf32> to vector<8x1xf32>
    %76 = tpu.reciprocal %75 {approx = true} : vector<8x1xf32> -> vector<8x1xf32>
    %77 = vector.broadcast %76 : vector<8x1xf32> to vector<8x8xf32>
    %78 = arith.mulf %73, %77 : vector<8x8xf32>
    %79 = arith.truncf %78 : vector<8x8xf32> to vector<8x8xbf16>
    %cst_28 = arith.constant dense<0.000000e+00> : vector<8x8xf32>
    %80 = tpu.matmul %79, %67, %cst_28 {dimension_numbers = #tpu.dot_dimension_numbers<[1], [0], [0], [1], [0, 0, 1, 1], [], []>} : vector<8x8xbf16>, vector<8x8xbf16>, vector<8x8xf32> -> vector<8x8xf32>
    %c0_29 = arith.constant 0 : index
    %c0_30 = arith.constant 0 : index
    %c24 = arith.constant 24 : index
    %81 = vector.load %arg4[%c0_29, %c0_30, %c24] : memref<1x8x32xf32, #tpu.memory_space<vmem>>, vector<1x8x8xf32>
    %82 = vector.shape_cast %81 : vector<1x8x8xf32> to vector<8x8xf32>
    %83 = vector.shape_cast %80 : vector<8x8xf32> to vector<1x8x8xf32>
    tpu.vector_store %arg4[%c0_29, %c0_30, %c24], %83 {strides = array<i32>} : memref<1x8x32xf32, #tpu.memory_space<vmem>>, vector<1x8x8xf32>,
    return
  }
  func.func @transform_0(%arg0: i32) -> (i32, i32, i32) {
    %c0_i32 = arith.constant 0 : i32
    %c0_i32_0 = arith.constant 0 : i32
    %c0_i32_1 = arith.constant 0 : i32
    return %arg0, %c0_i32, %c0_i32_0 : i32, i32, i32
  }
  func.func @transform_1(%arg0: i32) -> (i32, i32) {
    %c0_i32 = arith.constant 0 : i32
    %c0_i32_0 = arith.constant 0 : i32
    %c0_i32_1 = arith.constant 0 : i32
    return %c0_i32, %c0_i32_0 : i32, i32
  }
  func.func @transform_2(%arg0: i32) -> (i32, i32) {
    %c0_i32 = arith.constant 0 : i32
    %c0_i32_0 = arith.constant 0 : i32
    %c0_i32_1 = arith.constant 0 : i32
    return %c0_i32, %c0_i32_0 : i32, i32
  }
  func.func @transform_3(%arg0: i32) -> (i32, i32, i32) {
    %c0_i32 = arith.constant 0 : i32
    %c0_i32_0 = arith.constant 0 : i32
    %c0_i32_1 = arith.constant 0 : i32
    return %arg0, %c0_i32, %c0_i32_0 : i32, i32, i32
  }
}

</mosaic_0001>

<bundles_post_ra>
// kernel: tpu_custom_call.1
= control target key start
LH: loop header
LB: loop body
LE: loop exit
PB: predicated region body
PF: predicated region fallthrough
CT: control target
= control target key end

     0   :  { %8 = vsyncpa [#allocation3], 0  ;;  %s1464_s0 = inlined_call_operand.hbm [shape: bf16[2,8,32], index: 0, kind: input, shape index: {}]   ;;  %s1465_s1 = inlined_call_operand.hbm [shape: bf16[32,96], index: 1, kind: input, shape index: {}]   ;;  %s1466_s2 = inlined_call_operand.vmem [shape: f32[1,96], index: 2, kind: input, shape index: {}]   ;;  %s1467_s3 = inlined_call_operand.hbm [shape: f32[2,8,32], index: 3, kind: output, shape index: {}]  }
   0x1   :  { %10 = vsyncpa [#allocation3 + $0x1], 0 }
   0x2   :  { %11 = vsyncpa [#allocation6], 0 }
   0x3   :  { %12 = vsyncpa [#allocation4], 0 }
   0x4   :  { %14 = vsyncpa [#allocation4 + $0x1], 0  ;;  %s1190_s12 = smov 0   ;;  %s1192_s13 = smov 0  }
   0x5   :  { %s1194_s14 = smov 0   ;;  %s1196_s15 = smov 0  }
   0x6 LB: > { %s1211_s16 = sadd.s32 4294967295, %s1147_s15   ;;  %s825_s17 = sadd.s32 4294967294, %s1147_s15   ;;  %s1147_s15 = sphi %s1196_s15, %s1487_s15   ;;  %s1143_s14 = sphi %s1194_s14, %s1486_s14   ;;  %s1139_s13 = sphi %s1192_s13, %s1485_s13   ;;  %s1135_s12 = sphi %s1190_s12, %s1484_s12  }
   0x7   : > { %p40_p0 = scmp.ne.s32.totalorder %s1139_s13, %s1135_s12  ;;  %p1468_p1 = scmp.eq.s32.totalorder %s1211_s16, 0 }
   0x8   : > { %p112_p3 = scmp.eq.s32.totalorder %s825_s17, 1  ;;  %p826_p5 = scmp.ge.s32.totalorder %s1147_s15, 1 }
   0x9   : > { %p1220_p4 = por %p1468_p1, %p40_p0  ;;  %p119_p7 = scmp.lt.s32.totalorder %s1147_s15, 3 }
   0xa   : > { %p1225_p6 = por %p112_p3, %p40_p0  ;;  %s1149_s21 = smov [#allocation5]  }
   0xb   : > { %s1471_s18 = scalar_select %p1220_p4, 1, 0 }
   0xc   : > { %s1472_s19 = scalar_select %p1225_p6, 1, 0 }
   0xd   : > { %p1230_p8 = pnand %p826_p5, %p119_p7  ;;  %s131_s22 = sshll.u32 %s1149_s21, 4  ;;  %s1234_s22 = int_to_ptr.vmem [resolvable:$true] %s131_s22 }
   0xe   : > { %s1246_s24 = sadd.s32 1, %s1147_s15   ;;  %s27_s25 = sadd.s32 1, %s1143_s14 }
   0xf   : > { %s1473_s20 = scalar_select %p1230_p8, 1, 0 }
  0x10   : > { %p934_p9 = pneg %p1230_p8  ;;  %s24_s26 = ssub.s32 %s1147_s15, %s1246_s24 }
  0x11   : > { %s1019_s29 = scalar_lea.hbm %s1465_s1, 256 }
  0x12   : > { %p1241_p11 = pnand %p934_p9, %p1468_p1  ;;  %p1020_p12 = scmp.ne.s32.totalorder %s1465_s1, %s1019_s29 }
  0x13   : > { %p1026_p5 = scmp.lt.u32.totalorder %s1019_s29, %s1465_s1 }
  0x14   : > { %p1021_p13 = pneg %p1241_p11 }
  0x16   : > { %p1022_p0 = pnand %p1021_p13, %p1020_p12 }
  0x18   : > { %p1023_p3 = pneg %p1022_p0 }
  0x1a   : > { %p1028_p7 = pnand %p1026_p5, %p1023_p3 }
  0x1c   : > { %1031 = shalt.err (!%p1028_p7)
}
  0x1d   : > { %s1032_s7 = scalar_lea.vmem %s1234_s22, 256  ;;  %p1040_p2 = scmp.lt.s32.totalorder %s1234_s22, %s1234_s22 }
  0x1e   : > { %p1033_p9 = scmp.ne.s32.totalorder %s1234_s22, %s1032_s7  ;;  %p1041_p6 = scmp.lt.s32.totalorder %s1032_s7, %s1032_s7 }
  0x20   : > { %p1035_p10 = pnand %p1033_p9, %p1021_p13  ;;  %p1042_p4 = por %p1041_p6, %p1040_p2 }
  0x22   : > { %p1036_p1 = pneg %p1035_p10 }
  0x24   : > { %p1043_p8 = pnand %p1042_p4, %p1036_p1 }
  0x26   : > { %1046 = shalt.err (!%p1043_p8)
}
  0x27   : > { %s1150_s8 = smov 64   ;;  %s1151_s9 = smov 4  }
  0x28   : > { %937 = dma.hbm_to_vmem [thread:$0]  (!%p1241_p11), %s1465_s1, 256, %s1234_s22, [#allocation6], %s1150_s8, %s1150_s8, %s1151_s9  }
  0x29   : > { %p25_p2 = scmp.eq.s32.totalorder %s24_s26, 0  ;;  %p34_p1 = scmp.ne.s32.totalorder %s1143_s14, %s1139_s13 }
  0x2a   : > { %p35_p4 = scmp.eq.s32.totalorder %s1147_s15, 0  ;;  %p947_p6 = scmp.lt.s32.totalorder %s1147_s15, 2 }
  0x2b   : > { %s1277_s17 = scalar_select %p25_p2, %s1143_s14, %s27_s25  }
  0x2c   : > { %p36_p8 = por %p35_p4, %p34_p1  ;;  %p1475_p10 = scmp.eq.s32.totalorder %s1211_s16, 1 }
  0x2d   : > { %s148_s27 = sand.u32 1, %s1143_s14   ;;  %s830_s28 = sshll.u32 %s1147_s15, 6 }
  0x2e   : > { %p1281_p12 = por %p1475_p10, %p34_p1  ;;  %s829_s29 = sshll.u32 %s148_s27, 2 }
  0x2f   : > { %s1290_s4 = scalar_lea.hbm %s1464_s0, %s830_s28  ;;  %s152_s22 = scalar_lea.vmem [#allocation2], %s829_s29 }
  0x30   : > { %s159_s25 = sshll.u32 %s152_s22, 4  ;;  %p1292_p11 = pnand %p947_p6, %p36_p8  ;;  %s1296_s25 = int_to_ptr.vmem [resolvable:$true] %s159_s25 }
  0x31   : > { %s149_s5 = scalar_lea.sflag [#allocation3], %s148_s27  ;;  %s1047_s6 = scalar_lea.hbm %s1290_s4, 64 }
  0x32   : > { %p1048_p13 = scmp.ne.s32.totalorder %s1290_s4, %s1047_s6  ;;  %p1049_p0 = pneg %p1292_p11 }
  0x33   : > { %s1052_s9 = scalar_lea.hbm %s1464_s0, 128  ;;  %p1053_p7 = scmp.lt.u32.totalorder %s1290_s4, %s1464_s0 }
  0x34   : > { %p1050_p3 = pnand %p1049_p0, %p1048_p13  ;;  %p1054_p9 = scmp.lt.u32.totalorder %s1052_s9, %s1047_s6 }
  0x35   : > { %p1056_p1 = scmp.lt.u32.totalorder %s1047_s6, %s1290_s4 }
  0x36   : > { %p1051_p5 = pneg %p1050_p3  ;;  %p1055_p2 = por %p1054_p9, %p1053_p7 }
  0x38   : > { %p1057_p4 = por %p1056_p1, %p1055_p2 }
  0x3a   : > { %p1058_p6 = pnand %p1057_p4, %p1051_p5 }
  0x3c   : > { %1061 = shalt.err (!%p1058_p6)
}
  0x3d   : > { %s1062_s27 = scalar_lea.vmem %s1296_s25, 64  ;;  %s1152_s28 = smov [#allocation2]  }
  0x3e   : > { %p1063_p8 = scmp.ne.s32.totalorder %s1296_s25, %s1062_s27  ;;  %s1067_s29 = sshll.u32 %s1152_s28, 4  ;;  %s1068_s29 = int_to_ptr.vmem [resolvable:$false] %s1067_s29 }
  0x3f   : > { %s1069_s23 = scalar_lea.vmem %s1068_s29, 128  ;;  %p1070_p3 = scmp.lt.s32.totalorder %s1296_s25, %s1068_s29 }
  0x40   : > { %p1065_p10 = pnand %p1063_p8, %p1049_p0  ;;  %p1071_p7 = scmp.lt.s32.totalorder %s1069_s23, %s1062_s27 }
  0x42   : > { %p1066_p13 = pneg %p1065_p10  ;;  %p1072_p9 = por %p1071_p7, %p1070_p3 }
  0x44   : > { %p1073_p2 = pnand %p1072_p9, %p1066_p13 }
  0x46   : > { %1076 = shalt.err (!%p1073_p2)
}
  0x47   : > { %941 = dma.hbm_to_vmem [thread:$0]  (!%p1292_p11), %s1290_s4, 64, %s1296_s25, %s149_s5  }
  0x48   : > { %p1478_p5 = scmp.ne.s32.totalorder %s1473_s20, 0 }
  0x49   : > { %s1326_s30 = sand.u32 (!%p1478_p5), 1, %s1139_s13   ;;  %p1479_p0 = scmp.ne.s32.totalorder (!%p1478_p5), %s1471_s18, 0 }
  0x4a   : > { %168 = sbr.rel (%p1478_p5) target bundleno = 1365 (0x555), region = 32  ;;  %s832_s22 = sshll.u32 (!%p1478_p5), %s1326_s30, 2 }
  0x4b   : > { %s171_s6 = scalar_lea.sflag (!%p1478_p5), [#allocation3], %s1326_s30  ;;  %s174_s7 = scalar_lea.vmem (!%p1478_p5), [#allocation2], %s832_s22 }
  0x51   : > { %1122 = dma.done.wait (%p1479_p0), %s171_s6, 64  }
  0x52   : > { %1124 = vsyncadd (%p1479_p0), %s171_s6, 4294967232  ;;  %p1480_p1 = scmp.eq.s32.totalorder %s1211_s16, 0 }
  0x54   : > { %1126 = dma.done.wait (%p1480_p1), [#allocation6], 256   ;;  %p1481_p11 = pmov %p1480_p1 }
  0x55   : > { %v1153_v0 = vmov 0.0   ;;  %vm1154_vm0 = vmmov 0   ;;  %v1001_v1 = vld [vmem:[#allocation5] sm:$0xff]   ;;  %v1002_v2 = vld [vmem:[#allocation5 + $0x8] sm:$0xff]   ;;  %v202_v3 = vld [vmem:[%s174_s7] sm:$0xf] }
  0x56   : > { %1128 = vsyncadd (%p1481_p11), [#allocation6], 4294967040  ;;  %870 = vmatprep.subr.bf16.mxu0 %v1153_v0  ;;  %874 = vmatprep.mubr.msk.bf16.mxu0 %vm1154_vm0, %v1153_v0  ;;  %vm226_vm1 = vcmask 261120   ;;  %v835_v4 = vld [vmem:[%s1466_s2] ss:$0 sm:$0xff]  ;;  %s1155_s4 = smov 120  }
  0x57   : > { %878 = vmatprep.subr.bf16.mxu1 %v1153_v0  ;;  %880 = vmatprep.mubr.msk.bf16.mxu1 %vm1154_vm0, %v1153_v0  ;;  %s1156_s25 = smov 96   ;;  %s1157_s26 = smov 80   ;;  %vm274_vm2 = vcmask 64512   ;;  %vm338_vm3 = vcmask 1043456   ;;  %vm497_vm4 = vcmask 130112   ;;  %vm613_vm5 = vcmask 195712  }
  0x58   : > { %871 = vmatpush3.bf16.msra.mxu0 %v1001_v1  ;;  %s1158_s5 = smov 88   ;;  %s1159_s8 = smov 72   ;;  %vm729_vm6 = vcmask 261312  }
  0x59   : > { %872 = vmatprep.subr.bf16.mxu0 %v1153_v0  ;;  %s1160_s9 = smov 112   ;;  %s1161_s10 = smov 104  }
  0x5a   : > { %s1162_s11 = smov 56   ;;  %s1163_s27 = smov 64  }
  0x5b   : > { %s1164_s28 = smov 40   ;;  %s1165_s29 = smov 48  }
  0x5c   : > { %873 = vmatpush3.bf16.msra.mxu0 %v1002_v2  ;;  %s834_s23 = sshll.u32 %s1326_s30, 3  ;;  %s1166_s6 = smov 8  }
  0x5d   : > { %884 = vmatprep.subr.bf16.mxu0 %v1153_v0  ;;  %s1408_s22 = scalar_lea.vmem [#allocation7], %s834_s23  ;;  %s1167_s7 = smov 16  }
  0x5e   : > { %s1168_s18 = smov 24   ;;  %s848_s20 = sshll.u32 %s1211_s16, 7 }
  0x5f   : > { %875 = vmatmul.mubr.msk.bf16.vlgmr.msra.gmra.mrb[0].mxu0 %vm226_vm1, %v202_v3  ;;  %s1169_s16 = smov [#allocation7]  }
  0x60   : > { %886 = vmatprep.mubr.msk.bf16.mxu0 %vm1154_vm0, %v1153_v0 }
 0x132   : > { %v264_v5 = vpop.f32.mrb[0].mxu0 }
 0x133   : > { %v265_v6 = vadd.f32 %v835_v4, %v264_v5  ;;  %v876_v7 = vpop.f32.mrb[1].mxu0 }
 0x134   : > { %v267_v8 = vpop.f32.mrb[2].mxu0 }
 0x135   : > { %v1351_v9 = vpack.c.bf16 %v265_v6, %v265_v6  ;;  %v877_v10 = vpop.f32.mrb[3].mxu0 }
 0x137   : > { %383 = vrot.lane.b32.xlu1 %v1351_v9, %s1155_s4  ;;  %272 = vrot.lane.b32.xlu0 %v1351_v9, %s1156_s25  ;;  %s745_s4 = sshll.u32 %s1408_s22, 4  ;;  %s1421_s4 = int_to_ptr.vmem [resolvable:$true] %s745_s4 }
 0x13b   : > { %501 = vrot.lane.b32.xlu1 %v1351_v9, %s1157_s26  ;;  %385 = vrot.lane.b32.xlu0 %v1351_v9, %s1158_s5  ;;  %s1419_s5 = scalar_lea.hbm %s1467_s3, %s848_s20 }
 0x13f   : > { %617 = vrot.lane.b32.xlu1 %v1351_v9, %s1159_s8  ;;  %499 = vrot.lane.b32.xlu0 %v1351_v9, %s1160_s9  ;;  %s732_s8 = scalar_lea.sflag [#allocation4], %s1326_s30  ;;  %s1077_s9 = scalar_lea.vmem %s1421_s4, 128 }
 0x140   : > { %p1078_p4 = scmp.ne.s32.totalorder %s1421_s4, %s1077_s9 }
 0x142   : > { %p1079_p6 = pnand %p1078_p4, %p1281_p12 }
 0x143   : > { %615 = vrot.lane.b32.xlu0 %v1351_v9, %s1161_s10  ;;  %s1081_s10 = sshll.u32 %s1169_s16, 4  ;;  %s1082_s10 = int_to_ptr.vmem [resolvable:$false] %s1081_s10 }
 0x144   : > { %p1080_p8 = pneg %p1079_p6  ;;  %p1084_p10 = scmp.lt.s32.totalorder %s1421_s4, %s1082_s10 }
 0x1a9   : > { %v273_v11 = vpop.permute.xlu0 %272  ;;  %v384_v14 = vpop.permute.xlu1 %383 }
 0x1aa   : > { %v279_v12 = vsel %vm274_vm2, %v273_v11, 0 }
 0x1ab   : > { %879 = vmatpush3.bf16.xpose.msra.mxu1 %v279_v12 }
 0x1ac   : > { %890 = vmatprep.subr.bf16.mxu1 %v1153_v0 }
 0x1ad   : > { %v386_v13 = vpop.permute.xlu0 %385  ;;  %v502_v16 = vpop.permute.xlu1 %501 }
 0x1ae   : > { %v391_v15 = vsel %vm274_vm2, %v386_v13, 0  ;;  %v507_v17 = vsel %vm274_vm2, %v502_v16, 0 }
 0x1b1   : > { %v618_v18 = vpop.permute.xlu1 %617  ;;  %v500_v19 = vpop.permute.xlu0 %499 }
 0x1b2   : > { %881 = vmatmul.mubr.msk.bf16.vlgmr.msra.gmra.mrb[0].mxu1 %vm274_vm2, %v1351_v9  ;;  %v623_v20 = vsel %vm274_vm2, %v618_v18, 0 }
 0x1b3   : > { %891 = vmatpush3.bf16.xpose.msra.mxu1 %v391_v15  ;;  %892 = vmatprep.mubr.msk.bf16.mxu1 %vm1154_vm0, %v1153_v0 }
 0x1b4   : > { %902 = vmatprep.subr.bf16.mxu1 %v1153_v0 }
 0x1b5   : > { %v616_v21 = vpop.permute.xlu0 %615 }
 0x1ba   : > { %893 = vmatmul.mubr.msk.bf16.vlgmr.msra.gmra.mrb[4].mxu1 %vm274_vm2, %v384_v14 }
 0x1bb   : > { %903 = vmatpush3.bf16.xpose.msra.mxu1 %v507_v17  ;;  %904 = vmatprep.mubr.msk.bf16.mxu1 %vm1154_vm0, %v1153_v0 }
 0x1bc   : > { %914 = vmatprep.subr.bf16.mxu1 %v1153_v0 }
 0x1c2   : > { %905 = vmatmul.mubr.msk.bf16.vlgmr.msra.gmra.mrb[8].mxu1 %vm274_vm2, %v500_v19 }
 0x1c3   : > { %915 = vmatpush3.bf16.xpose.msra.mxu1 %v623_v20  ;;  %916 = vmatprep.mubr.msk.bf16.mxu1 %vm1154_vm0, %v1153_v0 }
 0x1ca   : > { %917 = vmatmul.mubr.msk.bf16.vlgmr.msra.gmra.mrb[12].mxu1 %vm274_vm2, %v616_v21 }
 0x285   : > { %v315_v22 = vpop.f32.mrb[0].mxu1 }
 0x286   : > { %v882_v23 = vpop.f32.mrb[1].mxu1  ;;  %v321_v24 = vsel %vm274_vm2, %v315_v22, -inf }
 0x287   : > { %322 = vmax.xlane.f32.xlu1 %v321_v24  ;;  %v318_v25 = vpop.f32.mrb[2].mxu1 }
 0x288   : > { %v883_v26 = vpop.f32.mrb[3].mxu1 }
 0x28d   : > { %v427_v27 = vpop.f32.mrb[4].mxu1 }
 0x28e   : > { %v894_v28 = vpop.f32.mrb[5].mxu1  ;;  %v433_v29 = vsel %vm274_vm2, %v427_v27, -inf }
 0x28f   : > { %434 = vmax.xlane.f32.xlu0 %v433_v29  ;;  %v430_v30 = vpop.f32.mrb[6].mxu1 }
 0x290   : > { %v895_v31 = vpop.f32.mrb[7].mxu1 }
 0x295   : > { %v543_v32 = vpop.f32.mrb[8].mxu1 }
 0x296   : > { %v906_v33 = vpop.f32.mrb[9].mxu1  ;;  %v549_v34 = vsel %vm274_vm2, %v543_v32, -inf }
 0x297   : > { %550 = vmax.xlane.f32.xlu0 %v549_v34  ;;  %v546_v35 = vpop.f32.mrb[10].mxu1 }
 0x298   : > { %v907_v36 = vpop.f32.mrb[11].mxu1 }
 0x29d   : > { %v659_v37 = vpop.f32.mrb[12].mxu1 }
 0x29e   : > { %v918_v38 = vpop.f32.mrb[13].mxu1  ;;  %v665_v39 = vsel %vm274_vm2, %v659_v37, -inf }
 0x29f   : > { %666 = vmax.xlane.f32.xlu1 %v665_v39  ;;  %v662_v40 = vpop.f32.mrb[14].mxu1 }
 0x2a0   : > { %v919_v41 = vpop.f32.mrb[15].mxu1 }
 0x314   : > { %v323_v42 = vpop.xlane.xlu1 %322 }
 0x315   : > { %v324_v43 = vsub.f32 %v315_v22, %v323_v42 }
 0x317   : > { %v325_v44 = vmul.f32 1.442695, %v324_v43 }
 0x319   : > { %1003 = vpow2.f32 %v325_v44 }
 0x31c   : > { %v435_v45 = vpop.xlane.xlu0 %434 }
 0x31d   : > { %v436_v46 = vsub.f32 %v427_v27, %v435_v45 }
 0x31f   : > { %v437_v47 = vmul.f32 1.442695, %v436_v46 }
 0x321   : > { %1005 = vpow2.f32 %v437_v47 }
 0x323   : > { %v1004_v48 = vpop.eup %1003 }
 0x324   : > { %v551_v49 = vpop.xlane.xlu0 %550  ;;  %v327_v50 = vsel %vm274_vm2, %v1004_v48, 0.0 }
 0x325   : > { %v552_v51 = vsub.f32 %v543_v32, %v551_v49  ;;  %328 = vadd.xlane.f32.xlu0 %v327_v50 }
 0x327   : > { %v553_v52 = vmul.f32 1.442695, %v552_v51 }
 0x329   : > { %1007 = vpow2.f32 %v553_v52 }
 0x32b   : > { %v1006_v53 = vpop.eup %1005 }
 0x32c   : > { %v439_v54 = vsel %vm274_vm2, %v1006_v53, 0.0  ;;  %v667_v57 = vpop.xlane.xlu1 %666 }
 0x32d   : > { %440 = vadd.xlane.f32.xlu1 %v439_v54  ;;  %v668_v58 = vsub.f32 %v659_v37, %v667_v57 }
 0x32f   : > { %v669_v59 = vmul.f32 1.442695, %v668_v58 }
 0x331   : > { %1009 = vpow2.f32 %v669_v59 }
 0x333   : > { %v1008_v55 = vpop.eup %1007 }
 0x334   : > { %v555_v56 = vsel %vm274_vm2, %v1008_v55, 0.0 }
 0x335   : > { %556 = vadd.xlane.f32.xlu0 %v555_v56 }
 0x33b   : > { %v1010_v60 = vpop.eup %1009 }
 0x33c   : > { %v671_v61 = vsel %vm274_vm2, %v1010_v60, 0.0 }
 0x33e   : > { %445 = vrot.lane.b32.xlu1 %v1351_v9, %s1162_s11  ;;  %s1083_s11 = scalar_lea.vmem %s1082_s10, 256 }
 0x33f   : > { %p1085_p13 = scmp.lt.s32.totalorder %s1083_s11, %s1077_s9 }
 0x341   : > { %p1086_p3 = por %p1085_p13, %p1084_p10 }
 0x343   : > { %p1087_p7 = pnand %p1086_p3, %p1080_p8 }
 0x34b   : > { %333 = vrot.lane.b32.xlu0 %v1351_v9, %s1163_s27 }
 0x34f   : > { %677 = vrot.lane.b32.xlu0 %v1351_v9, %s1164_s28 }
 0x362   : > { %672 = vadd.xlane.f32.xlu1 %v671_v61 }
 0x373   : > { %561 = vrot.lane.b32.xlu1 %v1351_v9, %s1165_s29 }
 0x3b2   : > { %v329_v62 = vpop.xlane.xlu0 %328 }
 0x3b3   : > { %1011 = vrcp.f32 %v329_v62 }
 0x3ba   : > { %v441_v63 = vpop.xlane.xlu1 %440 }
 0x3bb   : > { %1013 = vrcp.f32 %v441_v63 }
 0x3bd   : > { %v1012_v1 = vpop.eup %1011 }
 0x3be   : > { %v331_v3 = vmul.f32 %v1012_v1, %v1004_v48  ;;  %v446_v6 = vpop.permute.xlu1 %445 }
 0x3bf   : > { %v451_v10 = vsel %vm338_vm3, %v446_v6, 0 }
 0x3c0   : > { %v332_v7 = vpack.c.bf16 %v331_v3, %v331_v3 }
 0x3c2   : > { %v557_v2 = vpop.xlane.xlu0 %556 }
 0x3c3   : > { %1015 = vrcp.f32 %v557_v2 }
 0x3c5   : > { %v1014_v8 = vpop.eup %1013 }
 0x3c6   : > { %v334_v4 = vpop.permute.xlu0 %333  ;;  %v443_v9 = vmul.f32 %v1014_v8, %v1006_v53 }
 0x3c7   : > { %v340_v5 = vsel %vm338_vm3, %v334_v4, 0 }
 0x3c8   : > { %885 = vmatpush3.bf16.msra.mxu0 %v340_v5  ;;  %v444_v11 = vpack.c.bf16 %v443_v9, %v443_v9 }
 0x3c9   : > { %896 = vmatprep.subr.bf16.mxu0 %v1153_v0 }
 0x3ca   : > { %v678_v17 = vpop.permute.xlu0 %677 }
 0x3cb   : > { %887 = vmatmul.mubr.msk.bf16.vlgmr.msra.gmra.mrb[4].mxu0 %vm274_vm2, %v332_v7  ;;  %v683_v19 = vsel %vm338_vm3, %v678_v17, 0 }
 0x3cc   : > { %897 = vmatpush3.bf16.msra.mxu0 %v451_v10  ;;  %898 = vmatprep.mubr.msk.bf16.mxu0 %vm1154_vm0, %v1153_v0 }
 0x3cd   : > { %908 = vmatprep.subr.bf16.mxu0 %v1153_v0  ;;  %v1016_v12 = vpop.eup %1015 }
 0x3ce   : > { %v559_v14 = vmul.f32 %v1016_v12, %v1008_v55 }
 0x3d0   : > { %v560_v18 = vpack.c.bf16 %v559_v14, %v559_v14 }
 0x3d3   : > { %899 = vmatmul.mubr.msk.bf16.vlgmr.msra.gmra.mrb[8].mxu0 %vm274_vm2, %v444_v11 }
 0x3d4   : > { %910 = vmatprep.mubr.msk.bf16.mxu0 %vm1154_vm0, %v1153_v0 }
 0x3ef   : > { %v673_v13 = vpop.xlane.xlu1 %672 }
 0x3f0   : > { %1017 = vrcp.f32 %v673_v13 }
 0x3f3   : > { %v562_v15 = vpop.permute.xlu1 %561 }
 0x3f4   : > { %v567_v16 = vsel %vm338_vm3, %v562_v15, 0 }
 0x3f5   : > { %909 = vmatpush3.bf16.msra.mxu0 %v567_v16 }
 0x3f6   : > { %920 = vmatprep.subr.bf16.mxu0 %v1153_v0 }
 0x3f8   : > { %911 = vmatmul.mubr.msk.bf16.vlgmr.msra.gmra.mrb[12].mxu0 %vm274_vm2, %v560_v18 }
 0x3f9   : > { %921 = vmatpush3.bf16.msra.mxu0 %v683_v19  ;;  %922 = vmatprep.mubr.msk.bf16.mxu0 %vm1154_vm0, %v1153_v0 }
 0x3fa   : > { %v1018_v20 = vpop.eup %1017 }
 0x3fb   : > { %v675_v21 = vmul.f32 %v1018_v20, %v1010_v60 }
 0x3fd   : > { %v676_v22 = vpack.c.bf16 %v675_v21, %v675_v21 }
 0x400   : > { %923 = vmatmul.mubr.msk.bf16.vlgmr.msra.gmra.mrb[16].mxu0 %vm274_vm2, %v676_v22 }
 0x49e   : > { %v376_v23 = vpop.f32.mrb[4].mxu0 }
 0x49f   : > { %382 = vst.msk [vmem:[%s1408_s22] sm:$0xff] %vm274_vm2, %v376_v23  ;;  %v888_v24 = vpop.f32.mrb[5].mxu0 }
 0x4a0   : > { %v379_v25 = vpop.f32.mrb[6].mxu0 }
 0x4a1   : > { %v889_v26 = vpop.f32.mrb[7].mxu0 }
 0x4a6   : > { %v487_v27 = vpop.f32.mrb[8].mxu0 }
 0x4a7   : > { %494 = vrot.lane.b32.xlu1 %v487_v27, %s1166_s6  ;;  %v900_v28 = vpop.f32.mrb[9].mxu0 }
 0x4a8   : > { %v490_v0 = vpop.f32.mrb[10].mxu0 }
 0x4a9   : > { %v901_v29 = vpop.f32.mrb[11].mxu0 }
 0x4cb   : > { %v603_v30 = vpop.f32.mrb[12].mxu0 }
 0x4cc   : > { %610 = vrot.lane.b32.xlu0 %v603_v30, %s1167_s7  ;;  %v912_v31 = vpop.f32.mrb[13].mxu0 }
 0x4cd   : > { %v606_v32 = vpop.f32.mrb[14].mxu0 }
 0x4ce   : > { %v913_v33 = vpop.f32.mrb[15].mxu0 }
 0x4d3   : > { %v719_v34 = vpop.f32.mrb[16].mxu0 }
 0x4d4   : > { %726 = vrot.lane.b32.xlu1 %v719_v34, %s1168_s18  ;;  %v924_v35 = vpop.f32.mrb[17].mxu0 }
 0x4d5   : > { %v722_v36 = vpop.f32.mrb[18].mxu0 }
 0x4d6   : > { %v925_v37 = vpop.f32.mrb[19].mxu0 }
 0x519   : > { %v495_v38 = vpop.permute.xlu1 %494 }
 0x51a   : > { %498 = vst.msk [vmem:[%s1408_s22] sm:$0xff] %vm497_vm4, %v495_v38 }
 0x53e   : > { %v611_v39 = vpop.permute.xlu0 %610 }
 0x53f   : > { %614 = vst.msk [vmem:[%s1408_s22] sm:$0xff] %vm613_vm5, %v611_v39 }
 0x546   : > { %v727_v40 = vpop.permute.xlu1 %726 }
 0x547   : > { %730 = vst.msk [vmem:[%s1408_s22] sm:$0xff] %vm729_vm6, %v727_v40 }
 0x548   : > { %1090 = shalt.err (!%p1087_p7)
}
 0x549   : > { %s1091_s30 = scalar_lea.hbm %s1419_s5, 128  ;;  %s1095_s29 = scalar_lea.hbm %s1467_s3, 256 }
 0x54a   : > { %p1092_p9 = scmp.ne.s32.totalorder %s1419_s5, %s1091_s30  ;;  %p1096_p0 = scmp.lt.u32.totalorder %s1419_s5, %s1467_s3 }
 0x54b   : > { %p1097_p1 = scmp.lt.u32.totalorder %s1095_s29, %s1091_s30  ;;  %p1099_p4 = scmp.lt.u32.totalorder %s1091_s30, %s1419_s5 }
 0x54c   : > { %p1093_p2 = pnand %p1092_p9, %p1281_p12 }
 0x54d   : > { %p1098_p11 = por %p1097_p1, %p1096_p0 }
 0x54e   : > { %p1094_p5 = pneg %p1093_p2 }
 0x54f   : > { %p1100_p6 = por %p1099_p4, %p1098_p11 }
 0x551   : > { %p1101_p8 = pnand %p1100_p6, %p1094_p5 }
 0x553   : > { %1104 = shalt.err (!%p1101_p8)
}
 0x554   : > { %932 = dma.vmem_to_hbm [thread:$0]  (%p1281_p12), %s1421_s4, 128, %s1419_s5, %s732_s8  }
 0x555 PF: > { %s757_s6 = sand.u32 1, %s1135_s12   ;;  %p1482_p10 = scmp.ne.s32.totalorder %s1472_s19, 0 }
 0x556   : > { %p1483_p13 = scmp.ge.s32.totalorder %s1147_s15, 2  ;;  %s758_s7 = scalar_lea.sflag [#allocation4], %s757_s6 }
 0x558   : > { %p943_p3 = pnand %p1483_p13, %p1482_p10 }
 0x55a   : > { %1130 = dma.done.wait (!%p943_p3), %s758_s7, 128  }
 0x55b   : > { %1132 = vsyncadd (!%p943_p3), %s758_s7, 4294967168  ;;  %p17_p7 = scmp.ge.s32.totalorder %s1246_s24, 4   ;;  %s1484_s12 = smov %s1139_s13 }
 0x55c   : > { %s1485_s13 = smov %s1143_s14  ;;  %s1486_s14 = smov %s1277_s17 }
 0x55d   : > { %s1487_s15 = smov %s1246_s24  ;;  %19 = sbr.rel (!%p17_p7) target bundleno = 6 (0x6), region = 81 }
 0x564   :  { %763 = vsyncpa [#allocation3], 1 }
 0x565   :  { %765 = vsyncpa [#allocation3 + $0x1], 1 }
 0x566   :  { %766 = vsyncpa [#allocation6], 1 }
 0x567   :  { %767 = vsyncpa [#allocation4], 1 }
 0x568   :  { %769 = vsyncpa [#allocation4 + $0x1], 1 }

// kernel: tpu_custom_call.1
= control target key start
LH: loop header
LB: loop body
LE: loop exit
PB: predicated region body
PF: predicated region fallthrough
CT: control target
= control target key end

     0   :  { %8 = vsyncpa [#allocation3], 0  ;;  %s1464_s0 = inlined_call_operand.hbm [shape: bf16[2,8,32], index: 0, kind: input, shape index: {}]   ;;  %s1465_s1 = inlined_call_operand.hbm [shape: bf16[32,96], index: 1, kind: input, shape index: {}]   ;;  %s1466_s2 = inlined_call_operand.vmem [shape: f32[1,96], index: 2, kind: input, shape index: {}]   ;;  %s1467_s3 = inlined_call_operand.hbm [shape: f32[2,8,32], index: 3, kind: output, shape index: {}]  }
   0x1   :  { %10 = vsyncpa [#allocation3 + $0x1], 0 }
   0x2   :  { %11 = vsyncpa [#allocation6], 0 }
   0x3   :  { %12 = vsyncpa [#allocation4], 0 }
   0x4   :  { %14 = vsyncpa [#allocation4 + $0x1], 0  ;;  %s1190_s12 = smov 0   ;;  %s1192_s13 = smov 0  }
   0x5   :  { %s1194_s14 = smov 0   ;;  %s1196_s15 = smov 0  }
   0x6 LB: > { %s1211_s16 = sadd.s32 4294967295, %s1147_s15   ;;  %s825_s17 = sadd.s32 4294967294, %s1147_s15   ;;  %s1147_s15 = sphi %s1196_s15, %s1487_s15   ;;  %s1143_s14 = sphi %s1194_s14, %s1486_s14   ;;  %s1139_s13 = sphi %s1192_s13, %s1485_s13   ;;  %s1135_s12 = sphi %s1190_s12, %s1484_s12  }
   0x7   : > { %p40_p0 = scmp.ne.s32.totalorder %s1139_s13, %s1135_s12  ;;  %p1468_p1 = scmp.eq.s32.totalorder %s1211_s16, 0 }
   0x8   : > { %p112_p3 = scmp.eq.s32.totalorder %s825_s17, 1  ;;  %p826_p5 = scmp.ge.s32.totalorder %s1147_s15, 1 }
   0x9   : > { %p1220_p4 = por %p1468_p1, %p40_p0  ;;  %p119_p7 = scmp.lt.s32.totalorder %s1147_s15, 3 }
   0xa   : > { %p1225_p6 = por %p112_p3, %p40_p0  ;;  %s1149_s21 = smov [#allocation5]  }
   0xb   : > { %s1471_s18 = scalar_select %p1220_p4, 1, 0 }
   0xc   : > { %s1472_s19 = scalar_select %p1225_p6, 1, 0 }
   0xd   : > { %p1230_p8 = pnand %p826_p5, %p119_p7  ;;  %s131_s22 = sshll.u32 %s1149_s21, 4  ;;  %s1234_s22 = int_to_ptr.vmem [resolvable:$true] %s131_s22 }
   0xe   : > { %s1246_s24 = sadd.s32 1, %s1147_s15   ;;  %s27_s25 = sadd.s32 1, %s1143_s14 }
   0xf   : > { %s1473_s20 = scalar_select %p1230_p8, 1, 0 }
  0x10   : > { %p934_p9 = pneg %p1230_p8  ;;  %s24_s26 = ssub.s32 %s1147_s15, %s1246_s24 }
  0x11   : > { %s1019_s29 = scalar_lea.hbm %s1465_s1, 256 }
  0x12   : > { %p1241_p11 = pnand %p934_p9, %p1468_p1  ;;  %p1020_p12 = scmp.ne.s32.totalorder %s1465_s1, %s1019_s29 }
  0x13   : > { %p1026_p5 = scmp.lt.u32.totalorder %s1019_s29, %s1465_s1 }
  0x14   : > { %p1021_p13 = pneg %p1241_p11 }
  0x16   : > { %p1022_p0 = pnand %p1021_p13, %p1020_p12 }
  0x18   : > { %p1023_p3 = pneg %p1022_p0 }
  0x1a   : > { %p1028_p7 = pnand %p1026_p5, %p1023_p3 }
  0x1c   : > { %1031 = shalt.err (!%p1028_p7)
}
  0x1d   : > { %s1032_s7 = scalar_lea.vmem %s1234_s22, 256  ;;  %p1040_p2 = scmp.lt.s32.totalorder %s1234_s22, %s1234_s22 }
  0x1e   : > { %p1033_p9 = scmp.ne.s32.totalorder %s1234_s22, %s1032_s7  ;;  %p1041_p6 = scmp.lt.s32.totalorder %s1032_s7, %s1032_s7 }
  0x20   : > { %p1035_p10 = pnand %p1033_p9, %p1021_p13  ;;  %p1042_p4 = por %p1041_p6, %p1040_p2 }
  0x22   : > { %p1036_p1 = pneg %p1035_p10 }
  0x24   : > { %p1043_p8 = pnand %p1042_p4, %p1036_p1 }
  0x26   : > { %1046 = shalt.err (!%p1043_p8)
}
  0x27   : > { %s1150_s8 = smov 64   ;;  %s1151_s9 = smov 4  }
  0x28   : > { %937 = dma.hbm_to_vmem [thread:$0]  (!%p1241_p11), %s1465_s1, 256, %s1234_s22, [#allocation6], %s1150_s8, %s1150_s8, %s1151_s9  }
  0x29   : > { %p25_p2 = scmp.eq.s32.totalorder %s24_s26, 0  ;;  %p34_p1 = scmp.ne.s32.totalorder %s1143_s14, %s1139_s13 }
  0x2a   : > { %p35_p4 = scmp.eq.s32.totalorder %s1147_s15, 0  ;;  %p947_p6 = scmp.lt.s32.totalorder %s1147_s15, 2 }
  0x2b   : > { %s1277_s17 = scalar_select %p25_p2, %s1143_s14, %s27_s25  }
  0x2c   : > { %p36_p8 = por %p35_p4, %p34_p1  ;;  %p1475_p10 = scmp.eq.s32.totalorder %s1211_s16, 1 }
  0x2d   : > { %s148_s27 = sand.u32 1, %s1143_s14   ;;  %s830_s28 = sshll.u32 %s1147_s15, 6 }
  0x2e   : > { %p1281_p12 = por %p1475_p10, %p34_p1  ;;  %s829_s29 = sshll.u32 %s148_s27, 2 }
  0x2f   : > { %s1290_s4 = scalar_lea.hbm %s1464_s0, %s830_s28  ;;  %s152_s22 = scalar_lea.vmem [#allocation2], %s829_s29 }
  0x30   : > { %s159_s25 = sshll.u32 %s152_s22, 4  ;;  %p1292_p11 = pnand %p947_p6, %p36_p8  ;;  %s1296_s25 = int_to_ptr.vmem [resolvable:$true] %s159_s25 }
  0x31   : > { %s149_s5 = scalar_lea.sflag [#allocation3], %s148_s27  ;;  %s1047_s6 = scalar_lea.hbm %s1290_s4, 64 }
  0x32   : > { %p1048_p13 = scmp.ne.s32.totalorder %s1290_s4, %s1047_s6  ;;  %p1049_p0 = pneg %p1292_p11 }
  0x33   : > { %s1052_s9 = scalar_lea.hbm %s1464_s0, 128  ;;  %p1053_p7 = scmp.lt.u32.totalorder %s1290_s4, %s1464_s0 }
  0x34   : > { %p1050_p3 = pnand %p1049_p0, %p1048_p13  ;;  %p1054_p9 = scmp.lt.u32.totalorder %s1052_s9, %s1047_s6 }
  0x35   : > { %p1056_p1 = scmp.lt.u32.totalorder %s1047_s6, %s1290_s4 }
  0x36   : > { %p1051_p5 = pneg %p1050_p3  ;;  %p1055_p2 = por %p1054_p9, %p1053_p7 }
  0x38   : > { %p1057_p4 = por %p1056_p1, %p1055_p2 }
  0x3a   : > { %p1058_p6 = pnand %p1057_p4, %p1051_p5 }
  0x3c   : > { %1061 = shalt.err (!%p1058_p6)
}
  0x3d   : > { %s1062_s27 = scalar_lea.vmem %s1296_s25, 64  ;;  %s1152_s28 = smov [#allocation2]  }
  0x3e   : > { %p1063_p8 = scmp.ne.s32.totalorder %s1296_s25, %s1062_s27  ;;  %s1067_s29 = sshll.u32 %s1152_s28, 4  ;;  %s1068_s29 = int_to_ptr.vmem [resolvable:$false] %s1067_s29 }
  0x3f   : > { %s1069_s23 = scalar_lea.vmem %s1068_s29, 128  ;;  %p1070_p3 = scmp.lt.s32.totalorder %s1296_s25, %s1068_s29 }
  0x40   : > { %p1065_p10 = pnand %p1063_p8, %p1049_p0  ;;  %p1071_p7 = scmp.lt.s32.totalorder %s1069_s23, %s1062_s27 }
  0x42   : > { %p1066_p13 = pneg %p1065_p10  ;;  %p1072_p9 = por %p1071_p7, %p1070_p3 }
  0x44   : > { %p1073_p2 = pnand %p1072_p9, %p1066_p13 }
  0x46   : > { %1076 = shalt.err (!%p1073_p2)
}
  0x47   : > { %941 = dma.hbm_to_vmem [thread:$0]  (!%p1292_p11), %s1290_s4, 64, %s1296_s25, %s149_s5  }
  0x48   : > { %p1478_p5 = scmp.ne.s32.totalorder %s1473_s20, 0 }
  0x49   : > { %s1326_s30 = sand.u32 (!%p1478_p5), 1, %s1139_s13   ;;  %p1479_p0 = scmp.ne.s32.totalorder (!%p1478_p5), %s1471_s18, 0 }
  0x4a   : > { %168 = sbr.rel (%p1478_p5) target bundleno = 1365 (0x555), region = 32  ;;  %s832_s22 = sshll.u32 (!%p1478_p5), %s1326_s30, 2 }
  0x4b   : > { %s171_s6 = scalar_lea.sflag (!%p1478_p5), [#allocation3], %s1326_s30  ;;  %s174_s7 = scalar_lea.vmem (!%p1478_p5), [#allocation2], %s832_s22 }
  0x51   : > { %1122 = dma.done.wait (%p1479_p0), %s171_s6, 64  }
  0x52   : > { %1124 = vsyncadd (%p1479_p0), %s171_s6, 4294967232  ;;  %p1480_p1 = scmp.eq.s32.totalorder %s1211_s16, 0 }
  0x54   : > { %1126 = dma.done.wait (%p1480_p1), [#allocation6], 256   ;;  %p1481_p11 = pmov %p1480_p1 }
  0x55   : > { %v1153_v0 = vmov 0.0   ;;  %vm1154_vm0 = vmmov 0   ;;  %v1001_v1 = vld [vmem:[#allocation5] sm:$0xff]   ;;  %v1002_v2 = vld [vmem:[#allocation5 + $0x8] sm:$0xff]   ;;  %v202_v3 = vld [vmem:[%s174_s7] sm:$0xf] }
  0x56   : > { %1128 = vsyncadd (%p1481_p11), [#allocation6], 4294967040  ;;  %870 = vmatprep.subr.bf16.mxu0 %v1153_v0  ;;  %874 = vmatprep.mubr.msk.bf16.mxu0 %vm1154_vm0, %v1153_v0  ;;  %vm226_vm1 = vcmask 261120   ;;  %v835_v4 = vld [vmem:[%s1466_s2] ss:$0 sm:$0xff]  ;;  %s1155_s4 = smov 120  }
  0x57   : > { %878 = vmatprep.subr.bf16.mxu1 %v1153_v0  ;;  %880 = vmatprep.mubr.msk.bf16.mxu1 %vm1154_vm0, %v1153_v0  ;;  %s1156_s25 = smov 96   ;;  %s1157_s26 = smov 80   ;;  %vm274_vm2 = vcmask 64512   ;;  %vm338_vm3 = vcmask 1043456   ;;  %vm497_vm4 = vcmask 130112   ;;  %vm613_vm5 = vcmask 195712  }
  0x58   : > { %871 = vmatpush3.bf16.msra.mxu0 %v1001_v1  ;;  %s1158_s5 = smov 88   ;;  %s1159_s8 = smov 72   ;;  %vm729_vm6 = vcmask 261312  }
  0x59   : > { %872 = vmatprep.subr.bf16.mxu0 %v1153_v0  ;;  %s1160_s9 = smov 112   ;;  %s1161_s10 = smov 104  }
  0x5a   : > { %s1162_s11 = smov 56   ;;  %s1163_s27 = smov 64  }
  0x5b   : > { %s1164_s28 = smov 40   ;;  %s1165_s29 = smov 48  }
  0x5c   : > { %873 = vmatpush3.bf16.msra.mxu0 %v1002_v2  ;;  %s834_s23 = sshll.u32 %s1326_s30, 3  ;;  %s1166_s6 = smov 8  }
  0x5d   : > { %884 = vmatprep.subr.bf16.mxu0 %v1153_v0  ;;  %s1408_s22 = scalar_lea.vmem [#allocation7], %s834_s23  ;;  %s1167_s7 = smov 16  }
  0x5e   : > { %s1168_s18 = smov 24   ;;  %s848_s20 = sshll.u32 %s1211_s16, 7 }
  0x5f   : > { %875 = vmatmul.mubr.msk.bf16.vlgmr.msra.gmra.mrb[0].mxu0 %vm226_vm1, %v202_v3  ;;  %s1169_s16 = smov [#allocation7]  }
  0x60   : > { %886 = vmatprep.mubr.msk.bf16.mxu0 %vm1154_vm0, %v1153_v0 }
 0x132   : > { %v264_v5 = vpop.f32.mrb[0].mxu0 }
 0x133   : > { %v265_v6 = vadd.f32 %v835_v4, %v264_v5  ;;  %v876_v7 = vpop.f32.mrb[1].mxu0 }
 0x134   : > { %v267_v8 = vpop.f32.mrb[2].mxu0 }
 0x135   : > { %v1351_v9 = vpack.c.bf16 %v265_v6, %v265_v6  ;;  %v877_v10 = vpop.f32.mrb[3].mxu0 }
 0x137   : > { %383 = vrot.lane.b32.xlu1 %v1351_v9, %s1155_s4  ;;  %272 = vrot.lane.b32.xlu0 %v1351_v9, %s1156_s25  ;;  %s745_s4 = sshll.u32 %s1408_s22, 4  ;;  %s1421_s4 = int_to_ptr.vmem [resolvable:$true] %s745_s4 }
 0x13b   : > { %501 = vrot.lane.b32.xlu1 %v1351_v9, %s1157_s26  ;;  %385 = vrot.lane.b32.xlu0 %v1351_v9, %s1158_s5  ;;  %s1419_s5 = scalar_lea.hbm %s1467_s3, %s848_s20 }
 0x13f   : > { %617 = vrot.lane.b32.xlu1 %v1351_v9, %s1159_s8  ;;  %499 = vrot.lane.b32.xlu0 %v1351_v9, %s1160_s9  ;;  %s732_s8 = scalar_lea.sflag [#allocation4], %s1326_s30  ;;  %s1077_s9 = scalar_lea.vmem %s1421_s4, 128 }
 0x140   : > { %p1078_p4 = scmp.ne.s32.totalorder %s1421_s4, %s1077_s9 }
 0x142   : > { %p1079_p6 = pnand %p1078_p4, %p1281_p12 }
 0x143   : > { %615 = vrot.lane.b32.xlu0 %v1351_v9, %s1161_s10  ;;  %s1081_s10 = sshll.u32 %s1169_s16, 4  ;;  %s1082_s10 = int_to_ptr.vmem [resolvable:$false] %s1081_s10 }
 0x144   : > { %p1080_p8 = pneg %p1079_p6  ;;  %p1084_p10 = scmp.lt.s32.totalorder %s1421_s4, %s1082_s10 }
 0x1a9   : > { %v273_v11 = vpop.permute.xlu0 %272  ;;  %v384_v14 = vpop.permute.xlu1 %383 }
 0x1aa   : > { %v279_v12 = vsel %vm274_vm2, %v273_v11, 0 }
 0x1ab   : > { %879 = vmatpush3.bf16.xpose.msra.mxu1 %v279_v12 }
 0x1ac   : > { %890 = vmatprep.subr.bf16.mxu1 %v1153_v0 }
 0x1ad   : > { %v386_v13 = vpop.permute.xlu0 %385  ;;  %v502_v16 = vpop.permute.xlu1 %501 }
 0x1ae   : > { %v391_v15 = vsel %vm274_vm2, %v386_v13, 0  ;;  %v507_v17 = vsel %vm274_vm2, %v502_v16, 0 }
 0x1b1   : > { %v618_v18 = vpop.permute.xlu1 %617  ;;  %v500_v19 = vpop.permute.xlu0 %499 }
 0x1b2   : > { %881 = vmatmul.mubr.msk.bf16.vlgmr.msra.gmra.mrb[0].mxu1 %vm274_vm2, %v1351_v9  ;;  %v623_v20 = vsel %vm274_vm2, %v618_v18, 0 }
 0x1b3   : > { %891 = vmatpush3.bf16.xpose.msra.mxu1 %v391_v15  ;;  %892 = vmatprep.mubr.msk.bf16.mxu1 %vm1154_vm0, %v1153_v0 }
 0x1b4   : > { %902 = vmatprep.subr.bf16.mxu1 %v1153_v0 }
 0x1b5   : > { %v616_v21 = vpop.permute.xlu0 %615 }
 0x1ba   : > { %893 = vmatmul.mubr.msk.bf16.vlgmr.msra.gmra.mrb[4].mxu1 %vm274_vm2, %v384_v14 }
 0x1bb   : > { %903 = vmatpush3.bf16.xpose.msra.mxu1 %v507_v17  ;;  %904 = vmatprep.mubr.msk.bf16.mxu1 %vm1154_vm0, %v1153_v0 }
 0x1bc   : > { %914 = vmatprep.subr.bf16.mxu1 %v1153_v0 }
 0x1c2   : > { %905 = vmatmul.mubr.msk.bf16.vlgmr.msra.gmra.mrb[8].mxu1 %vm274_vm2, %v500_v19 }
 0x1c3   : > { %915 = vmatpush3.bf16.xpose.msra.mxu1 %v623_v20  ;;  %916 = vmatprep.mubr.msk.bf16.mxu1 %vm1154_vm0, %v1153_v0 }
 0x1ca   : > { %917 = vmatmul.mubr.msk.bf16.vlgmr.msra.gmra.mrb[12].mxu1 %vm274_vm2, %v616_v21 }
 0x285   : > { %v315_v22 = vpop.f32.mrb[0].mxu1 }
 0x286   : > { %v882_v23 = vpop.f32.mrb[1].mxu1  ;;  %v321_v24 = vsel %vm274_vm2, %v315_v22, -inf }
 0x287   : > { %322 = vmax.xlane.f32.xlu1 %v321_v24  ;;  %v318_v25 = vpop.f32.mrb[2].mxu1 }
 0x288   : > { %v883_v26 = vpop.f32.mrb[3].mxu1 }
 0x28d   : > { %v427_v27 = vpop.f32.mrb[4].mxu1 }
 0x28e   : > { %v894_v28 = vpop.f32.mrb[5].mxu1  ;;  %v433_v29 = vsel %vm274_vm2, %v427_v27, -inf }
 0x28f   : > { %434 = vmax.xlane.f32.xlu0 %v433_v29  ;;  %v430_v30 = vpop.f32.mrb[6].mxu1 }
 0x290   : > { %v895_v31 = vpop.f32.mrb[7].mxu1 }
 0x295   : > { %v543_v32 = vpop.f32.mrb[8].mxu1 }
 0x296   : > { %v906_v33 = vpop.f32.mrb[9].mxu1  ;;  %v549_v34 = vsel %vm274_vm2, %v543_v32, -inf }
 0x297   : > { %550 = vmax.xlane.f32.xlu0 %v549_v34  ;;  %v546_v35 = vpop.f32.mrb[10].mxu1 }
 0x298   : > { %v907_v36 = vpop.f32.mrb[11].mxu1 }
 0x29d   : > { %v659_v37 = vpop.f32.mrb[12].mxu1 }
 0x29e   : > { %v918_v38 = vpop.f32.mrb[13].mxu1  ;;  %v665_v39 = vsel %vm274_vm2, %v659_v37, -inf }
 0x29f   : > { %666 = vmax.xlane.f32.xlu1 %v665_v39  ;;  %v662_v40 = vpop.f32.mrb[14].mxu1 }
 0x2a0   : > { %v919_v41 = vpop.f32.mrb[15].mxu1 }
 0x314   : > { %v323_v42 = vpop.xlane.xlu1 %322 }
 0x315   : > { %v324_v43 = vsub.f32 %v315_v22, %v323_v42 }
 0x317   : > { %v325_v44 = vmul.f32 1.442695, %v324_v43 }
 0x319   : > { %1003 = vpow2.f32 %v325_v44 }
 0x31c   : > { %v435_v45 = vpop.xlane.xlu0 %434 }
 0x31d   : > { %v436_v46 = vsub.f32 %v427_v27, %v435_v45 }
 0x31f   : > { %v437_v47 = vmul.f32 1.442695, %v436_v46 }
 0x321   : > { %1005 = vpow2.f32 %v437_v47 }
 0x323   : > { %v1004_v48 = vpop.eup %1003 }
 0x324   : > { %v551_v49 = vpop.xlane.xlu0 %550  ;;  %v327_v50 = vsel %vm274_vm2, %v1004_v48, 0.0 }
 0x325   : > { %v552_v51 = vsub.f32 %v543_v32, %v551_v49  ;;  %328 = vadd.xlane.f32.xlu0 %v327_v50 }
 0x327   : > { %v553_v52 = vmul.f32 1.442695, %v552_v51 }
 0x329   : > { %1007 = vpow2.f32 %v553_v52 }
 0x32b   : > { %v1006_v53 = vpop.eup %1005 }
 0x32c   : > { %v439_v54 = vsel %vm274_vm2, %v1006_v53, 0.0  ;;  %v667_v57 = vpop.xlane.xlu1 %666 }
 0x32d   : > { %440 = vadd.xlane.f32.xlu1 %v439_v54  ;;  %v668_v58 = vsub.f32 %v659_v37, %v667_v57 }
 0x32f   : > { %v669_v59 = vmul.f32 1.442695, %v668_v58 }
 0x331   : > { %1009 = vpow2.f32 %v669_v59 }
 0x333   : > { %v1008_v55 = vpop.eup %1007 }
 0x334   : > { %v555_v56 = vsel %vm274_vm2, %v1008_v55, 0.0 }
 0x335   : > { %556 = vadd.xlane.f32.xlu0 %v555_v56 }
 0x33b   : > { %v1010_v60 = vpop.eup %1009 }
 0x33c   : > { %v671_v61 = vsel %vm274_vm2, %v1010_v60, 0.0 }
 0x33e   : > { %445 = vrot.lane.b32.xlu1 %v1351_v9, %s1162_s11  ;;  %s1083_s11 = scalar_lea.vmem %s1082_s10, 256 }
 0x33f   : > { %p1085_p13 = scmp.lt.s32.totalorder %s1083_s11, %s1077_s9 }
 0x341   : > { %p1086_p3 = por %p1085_p13, %p1084_p10 }
 0x343   : > { %p1087_p7 = pnand %p1086_p3, %p1080_p8 }
 0x34b   : > { %333 = vrot.lane.b32.xlu0 %v1351_v9, %s1163_s27 }
 0x34f   : > { %677 = vrot.lane.b32.xlu0 %v1351_v9, %s1164_s28 }
 0x362   : > { %672 = vadd.xlane.f32.xlu1 %v671_v61 }
 0x373   : > { %561 = vrot.lane.b32.xlu1 %v1351_v9, %s1165_s29 }
 0x3b2   : > { %v329_v62 = vpop.xlane.xlu0 %328 }
 0x3b3   : > { %1011 = vrcp.f32 %v329_v62 }
 0x3ba   : > { %v441_v63 = vpop.xlane.xlu1 %440 }
 0x3bb   : > { %1013 = vrcp.f32 %v441_v63 }
 0x3bd   : > { %v1012_v1 = vpop.eup %1011 }
 0x3be   : > { %v331_v3 = vmul.f32 %v1012_v1, %v1004_v48  ;;  %v446_v6 = vpop.permute.xlu1 %445 }
 0x3bf   : > { %v451_v10 = vsel %vm338_vm3, %v446_v6, 0 }
 0x3c0   : > { %v332_v7 = vpack.c.bf16 %v331_v3, %v331_v3 }
 0x3c2   : > { %v557_v2 = vpop.xlane.xlu0 %556 }
 0x3c3   : > { %1015 = vrcp.f32 %v557_v2 }
 0x3c5   : > { %v1014_v8 = vpop.eup %1013 }
 0x3c6   : > { %v334_v4 = vpop.permute.xlu0 %333  ;;  %v443_v9 = vmul.f32 %v1014_v8, %v1006_v53 }
 0x3c7   : > { %v340_v5 = vsel %vm338_vm3, %v334_v4, 0 }
 0x3c8   : > { %885 = vmatpush3.bf16.msra.mxu0 %v340_v5  ;;  %v444_v11 = vpack.c.bf16 %v443_v9, %v443_v9 }
 0x3c9   : > { %896 = vmatprep.subr.bf16.mxu0 %v1153_v0 }
 0x3ca   : > { %v678_v17 = vpop.permute.xlu0 %677 }
 0x3cb   : > { %887 = vmatmul.mubr.msk.bf16.vlgmr.msra.gmra.mrb[4].mxu0 %vm274_vm2, %v332_v7  ;;  %v683_v19 = vsel %vm338_vm3, %v678_v17, 0 }
 0x3cc   : > { %897 = vmatpush3.bf16.msra.mxu0 %v451_v10  ;;  %898 = vmatprep.mubr.msk.bf16.mxu0 %vm1154_vm0, %v1153_v0 }
 0x3cd   : > { %908 = vmatprep.subr.bf16.mxu0 %v1153_v0  ;;  %v1016_v12 = vpop.eup %1015 }
 0x3ce   : > { %v559_v14 = vmul.f32 %v1016_v12, %v1008_v55 }
 0x3d0   : > { %v560_v18 = vpack.c.bf16 %v559_v14, %v559_v14 }
 0x3d3   : > { %899 = vmatmul.mubr.msk.bf16.vlgmr.msra.gmra.mrb[8].mxu0 %vm274_vm2, %v444_v11 }
 0x3d4   : > { %910 = vmatprep.mubr.msk.bf16.mxu0 %vm1154_vm0, %v1153_v0 }
 0x3ef   : > { %v673_v13 = vpop.xlane.xlu1 %672 }
 0x3f0   : > { %1017 = vrcp.f32 %v673_v13 }
 0x3f3   : > { %v562_v15 = vpop.permute.xlu1 %561 }
 0x3f4   : > { %v567_v16 = vsel %vm338_vm3, %v562_v15, 0 }
 0x3f5   : > { %909 = vmatpush3.bf16.msra.mxu0 %v567_v16 }
 0x3f6   : > { %920 = vmatprep.subr.bf16.mxu0 %v1153_v0 }
 0x3f8   : > { %911 = vmatmul.mubr.msk.bf16.vlgmr.msra.gmra.mrb[12].mxu0 %vm274_vm2, %v560_v18 }
 0x3f9   : > { %921 = vmatpush3.bf16.msra.mxu0 %v683_v19  ;;  %922 = vmatprep.mubr.msk.bf16.mxu0 %vm1154_vm0, %v1153_v0 }
 0x3fa   : > { %v1018_v20 = vpop.eup %1017 }
 0x3fb   : > { %v675_v21 = vmul.f32 %v1018_v20, %v1010_v60 }
 0x3fd   : > { %v676_v22 = vpack.c.bf16 %v675_v21, %v675_v21 }
 0x400   : > { %923 = vmatmul.mubr.msk.bf16.vlgmr.msra.gmra.mrb[16].mxu0 %vm274_vm2, %v676_v22 }
 0x49e   : > { %v376_v23 = vpop.f32.mrb[4].mxu0 }
 0x49f   : > { %382 = vst.msk [vmem:[%s1408_s22] sm:$0xff] %vm274_vm2, %v376_v23  ;;  %v888_v24 = vpop.f32.mrb[5].mxu0 }
 0x4a0   : > { %v379_v25 = vpop.f32.mrb[6].mxu0 }
 0x4a1   : > { %v889_v26 = vpop.f32.mrb[7].mxu0 }
 0x4a6   : > { %v487_v27 = vpop.f32.mrb[8].mxu0 }
 0x4a7   : > { %494 = vrot.lane.b32.xlu1 %v487_v27, %s1166_s6  ;;  %v900_v28 = vpop.f32.mrb[9].mxu0 }
 0x4a8   : > { %v490_v0 = vpop.f32.mrb[10].mxu0 }
 0x4a9   : > { %v901_v29 = vpop.f32.mrb[11].mxu0 }
 0x4cb   : > { %v603_v30 = vpop.f32.mrb[12].mxu0 }
 0x4cc   : > { %610 = vrot.lane.b32.xlu0 %v603_v30, %s1167_s7  ;;  %v912_v31 = vpop.f32.mrb[13].mxu0 }
 0x4cd   : > { %v606_v32 = vpop.f32.mrb[14].mxu0 }
 0x4ce   : > { %v913_v33 = vpop.f32.mrb[15].mxu0 }
 0x4d3   : > { %v719_v34 = vpop.f32.mrb[16].mxu0 }
 0x4d4   : > { %726 = vrot.lane.b32.xlu1 %v719_v34, %s1168_s18  ;;  %v924_v35 = vpop.f32.mrb[17].mxu0 }
 0x4d5   : > { %v722_v36 = vpop.f32.mrb[18].mxu0 }
 0x4d6   : > { %v925_v37 = vpop.f32.mrb[19].mxu0 }
 0x519   : > { %v495_v38 = vpop.permute.xlu1 %494 }
 0x51a   : > { %498 = vst.msk [vmem:[%s1408_s22] sm:$0xff] %vm497_vm4, %v495_v38 }
 0x53e   : > { %v611_v39 = vpop.permute.xlu0 %610 }
 0x53f   : > { %614 = vst.msk [vmem:[%s1408_s22] sm:$0xff] %vm613_vm5, %v611_v39 }
 0x546   : > { %v727_v40 = vpop.permute.xlu1 %726 }
 0x547   : > { %730 = vst.msk [vmem:[%s1408_s22] sm:$0xff] %vm729_vm6, %v727_v40 }
 0x548   : > { %1090 = shalt.err (!%p1087_p7)
}
 0x549   : > { %s1091_s30 = scalar_lea.hbm %s1419_s5, 128  ;;  %s1095_s29 = scalar_lea.hbm %s1467_s3, 256 }
 0x54a   : > { %p1092_p9 = scmp.ne.s32.totalorder %s1419_s5, %s1091_s30  ;;  %p1096_p0 = scmp.lt.u32.totalorder %s1419_s5, %s1467_s3 }
 0x54b   : > { %p1097_p1 = scmp.lt.u32.totalorder %s1095_s29, %s1091_s30  ;;  %p1099_p4 = scmp.lt.u32.totalorder %s1091_s30, %s1419_s5 }
 0x54c   : > { %p1093_p2 = pnand %p1092_p9, %p1281_p12 }
 0x54d   : > { %p1098_p11 = por %p1097_p1, %p1096_p0 }
 0x54e   : > { %p1094_p5 = pneg %p1093_p2 }
 0x54f   : > { %p1100_p6 = por %p1099_p4, %p1098_p11 }
 0x551   : > { %p1101_p8 = pnand %p1100_p6, %p1094_p5 }
 0x553   : > { %1104 = shalt.err (!%p1101_p8)
}
 0x554   : > { %932 = dma.vmem_to_hbm [thread:$0]  (%p1281_p12), %s1421_s4, 128, %s1419_s5, %s732_s8  }
 0x555 PF: > { %s757_s6 = sand.u32 1, %s1135_s12   ;;  %p1482_p10 = scmp.ne.s32.totalorder %s1472_s19, 0 }
 0x556   : > { %p1483_p13 = scmp.ge.s32.totalorder %s1147_s15, 2  ;;  %s758_s7 = scalar_lea.sflag [#allocation4], %s757_s6 }
 0x558   : > { %p943_p3 = pnand %p1483_p13, %p1482_p10 }
 0x55a   : > { %1130 = dma.done.wait (!%p943_p3), %s758_s7, 128  }
 0x55b   : > { %1132 = vsyncadd (!%p943_p3), %s758_s7, 4294967168  ;;  %p17_p7 = scmp.ge.s32.totalorder %s1246_s24, 4   ;;  %s1484_s12 = smov %s1139_s13 }
 0x55c   : > { %s1485_s13 = smov %s1143_s14  ;;  %s1486_s14 = smov %s1277_s17 }
 0x55d   : > { %s1487_s15 = smov %s1246_s24  ;;  %19 = sbr.rel (!%p17_p7) target bundleno = 6 (0x6), region = 81 }
 0x564   :  { %763 = vsyncpa [#allocation3], 1 }
 0x565   :  { %765 = vsyncpa [#allocation3 + $0x1], 1 }
 0x566   :  { %766 = vsyncpa [#allocation6], 1 }
 0x567   :  { %767 = vsyncpa [#allocation4], 1 }
 0x568   :  { %769 = vsyncpa [#allocation4 + $0x1], 1 }

</bundles_post_ra>
